<compile_context>
chip_gen: v6e
topology: v6e:2x2x1
jax: 0.10.0
libtpu: 0.0.40
codegen_flags: <defaults>
</compile_context>

<pallas_src>
import jax
import jax.numpy as jnp
from jax import lax
from jax.experimental import pallas as pl
from jax.experimental.pallas import tpu as pltpu

LANES = 128


# ----------------------------- Pallas kernels ------------------------------ #

def conv_pool_kernel(p_ref, w_ref, b_ref, o_ref):
    """One image: conv-as-GEMM per pooling phase + 2x2 max-pool + bias + ReLU.

    p_ref: (1, 4, F, Np) bf16 phase-split im2col patches (F = Cin*K*K, Np = Hp*Wp)
    w_ref: (Cout, F)     bf16 conv weight as GEMM matrix
    b_ref: (Cout, 1)     f32 bias
    o_ref: (1, Cout, Np) f32 pooled output, lane-dense (spatial on lanes)
    """
    w = w_ref[...]
    # Four independent MXU dots, reduced with a max tree (no serial MXU->VPU chain).
    d0 = jnp.dot(w, p_ref[0, 0], preferred_element_type=jnp.float32)
    d1 = jnp.dot(w, p_ref[0, 1], preferred_element_type=jnp.float32)
    d2 = jnp.dot(w, p_ref[0, 2], preferred_element_type=jnp.float32)
    d3 = jnp.dot(w, p_ref[0, 3], preferred_element_type=jnp.float32)
    z = jnp.maximum(jnp.maximum(d0, d1), jnp.maximum(d2, d3))
    # Bias is phase-invariant and ReLU is monotone, so max-then-(bias+ReLU)
    # == pool(relu(conv + bias)).
    o_ref[0] = jnp.maximum(z + b_ref[...], 0.0)


def conv2_pool_mlp_kernel(p_ref, w2_ref, b2_ref, fc1w_ref, fc1b_ref,
                          fc2w_ref, fc2b_ref, fc3w_ref, fc3b_ref, o_ref):
    """Fused conv2 + 2x2 max-pool + ReLU + fc1 + ReLU + fc2 + ReLU + fc3 for one
    image; all intermediates stay on-chip.

    p_ref:   (1, 4, 150, 25) bf16 phase-split conv2 im2col patches
    w2_ref:  (16, 150)       bf16 conv2 weight as GEMM matrix
    b2_ref:  (16, 1)         f32
    fc1w_ref:(16, 25, 128)   f32, [c, s, :] = W1[c*25+s, :] zero-padded 120->128
    fc1b_ref:(1, 128)  fc2w_ref:(128, 128)  fc2b_ref:(1, 128)
    fc3w_ref:(128, 128) fc3b_ref:(1, 128)   (all zero-padded to 128 lanes)
    o_ref:   (1, 1, 128)  logits in lanes 0..9, zeros elsewhere
    """
    w2 = w2_ref[...]
    d0 = jnp.dot(w2, p_ref[0, 0], preferred_element_type=jnp.float32)
    d1 = jnp.dot(w2, p_ref[0, 1], preferred_element_type=jnp.float32)
    d2 = jnp.dot(w2, p_ref[0, 2], preferred_element_type=jnp.float32)
    d3 = jnp.dot(w2, p_ref[0, 3], preferred_element_type=jnp.float32)
    z = jnp.maximum(jnp.maximum(d0, d1), jnp.maximum(d2, d3))
    a = jnp.maximum(z + b2_ref[...], 0.0)               # (16, 25) pooled acts, f32

    # fc1 without flattening (16,25)->(400,) (a tiled-dim reshape): 16
    # *independent* (1,25)@(25,128) dots, combined with a log-depth add tree
    # so the MXU pushes pipeline instead of a 16-deep MXU->VPU chain.
    parts = [jnp.dot(a[c:c + 1, :], fc1w_ref[c],
                     preferred_element_type=jnp.float32)
             for c in range(a.shape[0])]
    while len(parts) > 1:
        parts = [parts[i] + parts[i + 1] for i in range(0, len(parts), 2)]
    h = jnp.maximum(parts[0] + fc1b_ref[...], 0.0)       # (1, 128)
    h = jnp.maximum(
        jnp.dot(h, fc2w_ref[...], preferred_element_type=jnp.float32)
        + fc2b_ref[...], 0.0)                            # (1, 128)
    o_ref[0] = (jnp.dot(h, fc3w_ref[...], preferred_element_type=jnp.float32)
                + fc3b_ref[...])                         # (1, 128)


# ------------------------------ wrapper glue -------------------------------- #

def pooled_phase_patches(x, K):
    """x: (B, C, H, W) -> (B, 4, C*K*K, Hp*Wp) im2col patches split by pool phase.

    Phase p = 2*dy + dx; column s = i*Wp + j is the patch of conv-output position
    (2*i + dy, 2*j + dx); row index = c*K*K + kh*K + kw, matching
    torch weight.reshape(Cout, Cin*K*K).  Built with 4 calls to
    lax.conv_general_dilated_patches (channel-major "chw" feature order) instead
    of ~100 strided slices."""
    B, C, H, W = x.shape
    Hp, Wp = (H - K + 1) // 2, (W - K + 1) // 2
    phases = []
    for dy in range(2):
        for dx in range(2):
            p = lax.conv_general_dilated_patches(
                x[:, :, dy:, dx:], (K, K), (2, 2), "VALID")   # (B, C*K*K, Hp, Wp)
            phases.append(p.reshape(B, C * K * K, Hp * Wp))
    return jnp.stack(phases, axis=1)                          # (B, 4, C*K*K, Hp*Wp)


def conv_pool_stage1(x, w, b, *, K=5):
    """x: (B, Cin, H, W); w: (Cout, Cin, K, K); b: (Cout,) -> (B, Cout, Hp, Wp)."""
    B, Cin, H, W = x.shape
    Cout = w.shape[0]
    Hp, Wp = (H - K + 1) // 2, (W - K + 1) // 2
    F, Np = Cin * K * K, Hp * Wp

    patches = pooled_phase_patches(x.astype(jnp.bfloat16), K)  # (B, 4, F, Np) bf16
    wmat = w.reshape(Cout, F).astype(jnp.bfloat16)
    bias = b.reshape(Cout, 1)

    out = pl.pallas_call(
        conv_pool_kernel,
        out_shape=jax.ShapeDtypeStruct((B, Cout, Np), jnp.float32),
        grid_spec=pltpu.PrefetchScalarGridSpec(
            num_scalar_prefetch=0,
            grid=(B,),
            in_specs=[
                pl.BlockSpec((1, 4, F, Np), lambda bi: (bi, 0, 0, 0)),
                pl.BlockSpec((Cout, F), lambda bi: (0, 0)),
                pl.BlockSpec((Cout, 1), lambda bi: (0, 0)),
            ],
            out_specs=pl.BlockSpec((1, Cout, Np), lambda bi: (bi, 0, 0)),
        ),
        compiler_params=pltpu.CompilerParams(dimension_semantics=("parallel",)),
    )(patches, wmat, bias)
    return out.reshape(B, Cout, Hp, Wp)                   # cheap contiguous reshape


def _pad_to(x, shape):
    return jnp.pad(x, [(0, s - d) for d, s in zip(x.shape, shape)])


def conv2_pool_mlp(h1, p, *, K=5):
    """h1: (B, 6, 14, 14) -> logits (B, 10); conv2+pool2+MLP fused in one kernel."""
    B, Cin, H, W = h1.shape
    Cout = p["conv2_w"].shape[0]
    Hp, Wp = (H - K + 1) // 2, (W - K + 1) // 2
    F, Np = Cin * K * K, Hp * Wp                          # 150, 25

    patches = pooled_phase_patches(h1.astype(jnp.bfloat16), K)   # (B, 4, 150, 25)
    w2mat = p["conv2_w"].reshape(Cout, F).astype(jnp.bfloat16)
    b2 = p["conv2_b"].reshape(Cout, 1)

    # FC weights/biases zero-padded to 128 lanes -> every FC GEMM is one full
    # MXU tile wide, all FC loads/stores unmasked. Padded rows/cols are zero so
    # padded lanes stay exactly 0 through relu and are sliced off afterwards.
    fc1w = _pad_to(p["fc1_w"].reshape(Cout, Np, 120), (Cout, Np, LANES))
    fc1b = _pad_to(p["fc1_b"], (1, LANES))
    fc2w = _pad_to(p["fc2_w"], (LANES, LANES))
    fc2b = _pad_to(p["fc2_b"], (1, LANES))
    fc3w = _pad_to(p["fc3_w"], (LANES, LANES))
    fc3b = _pad_to(p["fc3_b"], (1, LANES))

    out = pl.pallas_call(
        conv2_pool_mlp_kernel,
        out_shape=jax.ShapeDtypeStruct((B, 1, LANES), jnp.float32),
        grid_spec=pltpu.PrefetchScalarGridSpec(
            num_scalar_prefetch=0,
            grid=(B,),
            in_specs=[
                pl.BlockSpec((1, 4, F, Np), lambda bi: (bi, 0, 0, 0)),
                pl.BlockSpec((Cout, F), lambda bi: (0, 0)),
                pl.BlockSpec((Cout, 1), lambda bi: (0, 0)),
                pl.BlockSpec((Cout, Np, LANES), lambda bi: (0, 0, 0)),
                pl.BlockSpec((1, LANES), lambda bi: (0, 0)),
                pl.BlockSpec((LANES, LANES), lambda bi: (0, 0)),
                pl.BlockSpec((1, LANES), lambda bi: (0, 0)),
                pl.BlockSpec((LANES, LANES), lambda bi: (0, 0)),
                pl.BlockSpec((1, LANES), lambda bi: (0, 0)),
            ],
            out_specs=pl.BlockSpec((1, 1, LANES), lambda bi: (bi, 0, 0)),
        ),
        compiler_params=pltpu.CompilerParams(dimension_semantics=("parallel",)),
    )(patches, w2mat, b2, fc1w, fc1b, fc2w, fc2b, fc3w, fc3b)
    return out.reshape(B, LANES)[:, :10]


def simple_cnn_forward(x, p):
    h = conv_pool_stage1(x, p["conv1_w"], p["conv1_b"], K=5)   # (B, 6, 14, 14)
    return conv2_pool_mlp(h, p, K=5)                           # (B, 10)


# ------------------------- params + pure-JAX reference ---------------------- #

def init_params(key):
    ks = jax.random.split(key, 10)

    def u(k, shape, fan_in):
        bound = 1.0 / jnp.sqrt(float(fan_in))
        return jax.random.uniform(k, shape, jnp.float32, -bound, bound)

    return {
        "conv1_w": u(ks[0], (6, 3, 5, 5), 3 * 25),
        "conv1_b": u(ks[1], (6,), 3 * 25),
        "conv2_w": u(ks[2], (16, 6, 5, 5), 6 * 25),
        "conv2_b": u(ks[3], (16,), 6 * 25),
        "fc1_w": u(ks[4], (400, 120), 400),
        "fc1_b": u(ks[5], (1, 120), 400),
        "fc2_w": u(ks[6], (120, 84), 120),
        "fc2_b": u(ks[7], (1, 84), 120),
        "fc3_w": u(ks[8], (84, 10), 84),
        "fc3_b": u(ks[9], (1, 10), 84),
    }


def reference_forward(x, p):
    def conv(y, w, b):
        z = lax.conv_general_dilated(y, w, (1, 1), "VALID",
                                     dimension_numbers=("NCHW", "OIHW", "NCHW"))
        return z + b.reshape(1, -1, 1, 1)

    def pool(y):
        return lax.reduce_window(y, -jnp.inf, lax.max,
                                 (1, 1, 2, 2), (1, 1, 2, 2), "VALID")

    h = pool(jax.nn.relu(conv(x, p["conv1_w"], p["conv1_b"])))
    h = pool(jax.nn.relu(conv(h, p["conv2_w"], p["conv2_b"])))
    h = h.reshape(x.shape[0], -1)
    h = jax.nn.relu(h @ p["fc1_w"] + p["fc1_b"])
    h = jax.nn.relu(h @ p["fc2_w"] + p["fc2_b"])
    return h @ p["fc3_w"] + p["fc3_b"]


if __name__ == "__main__":
    key = jax.random.PRNGKey(0)
    pkey, xkey = jax.random.split(key)
    params = init_params(pkey)
    # input implied by the module: 3x32x32 images (16*5*5 flatten); small batch=2
    x = jax.random.normal(xkey, (2, 3, 32, 32), jnp.float32)

    forward = jax.jit(simple_cnn_forward)
    out = jax.block_until_ready(forward(x, params))
    ref = jax.block_until_ready(reference_forward(x, params))

    assert out.shape == (2, 10)
    # Tolerance sized for bf16 conv-GEMM operands (f32 accumulation, f32 FC path);
    # still ~10x below the observed error of any layout/indexing bug.
    if not jnp.allclose(out, ref, atol=2e-2, rtol=2e-2):
        raise AssertionError(
            f"mismatch vs reference, max abs err = {jnp.max(jnp.abs(out - ref))}")
    print("KERNEL_OK")
</pallas_src>

<mosaic_0001>
module attributes {stable_mosaic.version = 11 : i64} {
  func.func @conv_pool_kernel(%arg0: i32, %arg1: memref<1x4x75x196xbf16, #tpu.memory_space<vmem>>, %arg2: memref<6x75xbf16, #tpu.memory_space<vmem>>, %arg3: memref<6x1xf32, #tpu.memory_space<vmem>>, %arg4: memref<1x6x196xf32, #tpu.memory_space<vmem>>) attributes {dimension_semantics = [#tpu.dimension_semantics<parallel>], iteration_bounds = array<i64: 2>, scalar_prefetch = 0 : i64, scratch_operands = 0 : i64, tpu.core_type = #tpu.core_type<tc>, window_params = [{transform_indices = @transform_0, window_bounds = array<i64: 1, 4, 75, 196>}, {pipeline_mode = #tpu.pipeline_mode<synchronous>, transform_indices = @transform_1, window_bounds = array<i64: 6, 75>}, {pipeline_mode = #tpu.pipeline_mode<synchronous>, transform_indices = @transform_2, window_bounds = array<i64: 6, 1>}, {transform_indices = @transform_3, window_bounds = array<i64: 1, 6, 196>}]} {
    %c0 = arith.constant 0 : index
    %c0_0 = arith.constant 0 : index
    %0 = vector.load %arg2[%c0, %c0_0] : memref<6x75xbf16, #tpu.memory_space<vmem>>, vector<6x75xbf16>
    %c0_1 = arith.constant 0 : index
    %c0_2 = arith.constant 0 : index
    %c0_3 = arith.constant 0 : index
    %c0_4 = arith.constant 0 : index
    %1 = vector.load %arg1[%c0_1, %c0_2, %c0_3, %c0_4] : memref<1x4x75x196xbf16, #tpu.memory_space<vmem>>, vector<1x1x75x196xbf16>
    %2 = vector.shape_cast %1 : vector<1x1x75x196xbf16> to vector<75x196xbf16>
    %cst = arith.constant dense<0.000000e+00> : vector<6x196xf32>
    %3 = tpu.matmul %0, %2, %cst {dimension_numbers = #tpu.dot_dimension_numbers<[1], [0], [0], [1], [0, 0, 1, 1], [], []>} : vector<6x75xbf16>, vector<75x196xbf16>, vector<6x196xf32> -> vector<6x196xf32>
    %c0_5 = arith.constant 0 : index
    %c1 = arith.constant 1 : index
    %c0_6 = arith.constant 0 : index
    %c0_7 = arith.constant 0 : index
    %4 = vector.load %arg1[%c0_5, %c1, %c0_6, %c0_7] : memref<1x4x75x196xbf16, #tpu.memory_space<vmem>>, vector<1x1x75x196xbf16>
    %5 = vector.shape_cast %4 : vector<1x1x75x196xbf16> to vector<75x196xbf16>
    %cst_8 = arith.constant dense<0.000000e+00> : vector<6x196xf32>
    %6 = tpu.matmul %0, %5, %cst_8 {dimension_numbers = #tpu.dot_dimension_numbers<[1], [0], [0], [1], [0, 0, 1, 1], [], []>} : vector<6x75xbf16>, vector<75x196xbf16>, vector<6x196xf32> -> vector<6x196xf32>
    %c0_9 = arith.constant 0 : index
    %c2 = arith.constant 2 : index
    %c0_10 = arith.constant 0 : index
    %c0_11 = arith.constant 0 : index
    %7 = vector.load %arg1[%c0_9, %c2, %c0_10, %c0_11] : memref<1x4x75x196xbf16, #tpu.memory_space<vmem>>, vector<1x1x75x196xbf16>
    %8 = vector.shape_cast %7 : vector<1x1x75x196xbf16> to vector<75x196xbf16>
    %cst_12 = arith.constant dense<0.000000e+00> : vector<6x196xf32>
    %9 = tpu.matmul %0, %8, %cst_12 {dimension_numbers = #tpu.dot_dimension_numbers<[1], [0], [0], [1], [0, 0, 1, 1], [], []>} : vector<6x75xbf16>, vector<75x196xbf16>, vector<6x196xf32> -> vector<6x196xf32>
    %c0_13 = arith.constant 0 : index
    %c3 = arith.constant 3 : index
    %c0_14 = arith.constant 0 : index
    %c0_15 = arith.constant 0 : index
    %10 = vector.load %arg1[%c0_13, %c3, %c0_14, %c0_15] : memref<1x4x75x196xbf16, #tpu.memory_space<vmem>>, vector<1x1x75x196xbf16>
    %11 = vector.shape_cast %10 : vector<1x1x75x196xbf16> to vector<75x196xbf16>
    %cst_16 = arith.constant dense<0.000000e+00> : vector<6x196xf32>
    %12 = tpu.matmul %0, %11, %cst_16 {dimension_numbers = #tpu.dot_dimension_numbers<[1], [0], [0], [1], [0, 0, 1, 1], [], []>} : vector<6x75xbf16>, vector<75x196xbf16>, vector<6x196xf32> -> vector<6x196xf32>
    %13 = arith.maximumf %3, %6 : vector<6x196xf32>
    %14 = arith.maximumf %9, %12 : vector<6x196xf32>
    %15 = arith.maximumf %13, %14 : vector<6x196xf32>
    %c0_17 = arith.constant 0 : index
    %c0_18 = arith.constant 0 : index
    %16 = vector.load %arg3[%c0_17, %c0_18] : memref<6x1xf32, #tpu.memory_space<vmem>>, vector<6x1xf32>
    %17 = vector.broadcast %16 : vector<6x1xf32> to vector<6x196xf32>
    %18 = arith.addf %15, %17 : vector<6x196xf32>
    %cst_19 = arith.constant 0.000000e+00 : f32
    %19 = vector.broadcast %cst_19 : f32 to vector<6x196xf32>
    %20 = arith.maximumf %18, %19 : vector<6x196xf32>
    %c0_20 = arith.constant 0 : index
    %c0_21 = arith.constant 0 : index
    %c0_22 = arith.constant 0 : index
    %21 = vector.load %arg4[%c0_20, %c0_21, %c0_22] : memref<1x6x196xf32, #tpu.memory_space<vmem>>, vector<1x6x196xf32>
    %22 = vector.shape_cast %21 : vector<1x6x196xf32> to vector<6x196xf32>
    %23 = vector.shape_cast %20 : vector<6x196xf32> to vector<1x6x196xf32>
    tpu.vector_store %arg4[%c0_20, %c0_21, %c0_22], %23 {strides = array<i32>} : memref<1x6x196xf32, #tpu.memory_space<vmem>>, vector<1x6x196xf32>,
    return
  }
  func.func @transform_0(%arg0: i32) -> (i32, i32, i32, i32) {
    %c0_i32 = arith.constant 0 : i32
    %c0_i32_0 = arith.constant 0 : i32
    %c0_i32_1 = arith.constant 0 : i32
    %c0_i32_2 = arith.constant 0 : i32
    return %arg0, %c0_i32, %c0_i32_0, %c0_i32_1 : i32, i32, i32, i32
  }
  func.func @transform_1(%arg0: i32) -> (i32, i32) {
    %c0_i32 = arith.constant 0 : i32
    %c0_i32_0 = arith.constant 0 : i32
    %c0_i32_1 = arith.constant 0 : i32
    return %c0_i32, %c0_i32_0 : i32, i32
  }
  func.func @transform_2(%arg0: i32) -> (i32, i32) {
    %c0_i32 = arith.constant 0 : i32
    %c0_i32_0 = arith.constant 0 : i32
    %c0_i32_1 = arith.constant 0 : i32
    return %c0_i32, %c0_i32_0 : i32, i32
  }
  func.func @transform_3(%arg0: i32) -> (i32, i32, i32) {
    %c0_i32 = arith.constant 0 : i32
    %c0_i32_0 = arith.constant 0 : i32
    %c0_i32_1 = arith.constant 0 : i32
    return %arg0, %c0_i32, %c0_i32_0 : i32, i32, i32
  }
}

module attributes {stable_mosaic.version = 11 : i64} {
  func.func @conv2_pool_mlp_kernel(%arg0: i32, %arg1: memref<1x4x150x25xbf16, #tpu.memory_space<vmem>>, %arg2: memref<16x150xbf16, #tpu.memory_space<vmem>>, %arg3: memref<16x1xf32, #tpu.memory_space<vmem>>, %arg4: memref<16x25x128xf32, #tpu.memory_space<vmem>>, %arg5: memref<1x128xf32, #tpu.memory_space<vmem>>, %arg6: memref<128x128xf32, #tpu.memory_space<vmem>>, %arg7: memref<1x128xf32, #tpu.memory_space<vmem>>, %arg8: memref<128x128xf32, #tpu.memory_space<vmem>>, %arg9: memref<1x128xf32, #tpu.memory_space<vmem>>, %arg10: memref<1x1x128xf32, #tpu.memory_space<vmem>>) attributes {dimension_semantics = [#tpu.dimension_semantics<parallel>], iteration_bounds = array<i64: 2>, scalar_prefetch = 0 : i64, scratch_operands = 0 : i64, tpu.core_type = #tpu.core_type<tc>, window_params = [{transform_indices = @transform_0, window_bounds = array<i64: 1, 4, 150, 25>}, {pipeline_mode = #tpu.pipeline_mode<synchronous>, transform_indices = @transform_1, window_bounds = array<i64: 16, 150>}, {pipeline_mode = #tpu.pipeline_mode<synchronous>, transform_indices = @transform_2, window_bounds = array<i64: 16, 1>}, {pipeline_mode = #tpu.pipeline_mode<synchronous>, transform_indices = @transform_3, window_bounds = array<i64: 16, 25, 128>}, {pipeline_mode = #tpu.pipeline_mode<synchronous>, transform_indices = @transform_4, window_bounds = array<i64: 1, 128>}, {pipeline_mode = #tpu.pipeline_mode<synchronous>, transform_indices = @transform_5, window_bounds = array<i64: 128, 128>}, {pipeline_mode = #tpu.pipeline_mode<synchronous>, transform_indices = @transform_6, window_bounds = array<i64: 1, 128>}, {pipeline_mode = #tpu.pipeline_mode<synchronous>, transform_indices = @transform_7, window_bounds = array<i64: 128, 128>}, {pipeline_mode = #tpu.pipeline_mode<synchronous>, transform_indices = @transform_8, window_bounds = array<i64: 1, 128>}, {transform_indices = @transform_9, window_bounds = array<i64: 1, 1, 128>}]} {
    %c0 = arith.constant 0 : index
    %c0_0 = arith.constant 0 : index
    %0 = vector.load %arg2[%c0, %c0_0] : memref<16x150xbf16, #tpu.memory_space<vmem>>, vector<16x150xbf16>
    %c0_1 = arith.constant 0 : index
    %c0_2 = arith.constant 0 : index
    %c0_3 = arith.constant 0 : index
    %c0_4 = arith.constant 0 : index
    %1 = vector.load %arg1[%c0_1, %c0_2, %c0_3, %c0_4] : memref<1x4x150x25xbf16, #tpu.memory_space<vmem>>, vector<1x1x150x25xbf16>
    %2 = vector.shape_cast %1 : vector<1x1x150x25xbf16> to vector<150x25xbf16>
    %cst = arith.constant dense<0.000000e+00> : vector<16x25xf32>
    %3 = tpu.matmul %0, %2, %cst {dimension_numbers = #tpu.dot_dimension_numbers<[1], [0], [0], [1], [0, 0, 1, 1], [], []>} : vector<16x150xbf16>, vector<150x25xbf16>, vector<16x25xf32> -> vector<16x25xf32>
    %c0_5 = arith.constant 0 : index
    %c1 = arith.constant 1 : index
    %c0_6 = arith.constant 0 : index
    %c0_7 = arith.constant 0 : index
    %4 = vector.load %arg1[%c0_5, %c1, %c0_6, %c0_7] : memref<1x4x150x25xbf16, #tpu.memory_space<vmem>>, vector<1x1x150x25xbf16>
    %5 = vector.shape_cast %4 : vector<1x1x150x25xbf16> to vector<150x25xbf16>
    %cst_8 = arith.constant dense<0.000000e+00> : vector<16x25xf32>
    %6 = tpu.matmul %0, %5, %cst_8 {dimension_numbers = #tpu.dot_dimension_numbers<[1], [0], [0], [1], [0, 0, 1, 1], [], []>} : vector<16x150xbf16>, vector<150x25xbf16>, vector<16x25xf32> -> vector<16x25xf32>
    %c0_9 = arith.constant 0 : index
    %c2 = arith.constant 2 : index
    %c0_10 = arith.constant 0 : index
    %c0_11 = arith.constant 0 : index
    %7 = vector.load %arg1[%c0_9, %c2, %c0_10, %c0_11] : memref<1x4x150x25xbf16, #tpu.memory_space<vmem>>, vector<1x1x150x25xbf16>
    %8 = vector.shape_cast %7 : vector<1x1x150x25xbf16> to vector<150x25xbf16>
    %cst_12 = arith.constant dense<0.000000e+00> : vector<16x25xf32>
    %9 = tpu.matmul %0, %8, %cst_12 {dimension_numbers = #tpu.dot_dimension_numbers<[1], [0], [0], [1], [0, 0, 1, 1], [], []>} : vector<16x150xbf16>, vector<150x25xbf16>, vector<16x25xf32> -> vector<16x25xf32>
    %c0_13 = arith.constant 0 : index
    %c3 = arith.constant 3 : index
    %c0_14 = arith.constant 0 : index
    %c0_15 = arith.constant 0 : index
    %10 = vector.load %arg1[%c0_13, %c3, %c0_14, %c0_15] : memref<1x4x150x25xbf16, #tpu.memory_space<vmem>>, vector<1x1x150x25xbf16>
    %11 = vector.shape_cast %10 : vector<1x1x150x25xbf16> to vector<150x25xbf16>
    %cst_16 = arith.constant dense<0.000000e+00> : vector<16x25xf32>
    %12 = tpu.matmul %0, %11, %cst_16 {dimension_numbers = #tpu.dot_dimension_numbers<[1], [0], [0], [1], [0, 0, 1, 1], [], []>} : vector<16x150xbf16>, vector<150x25xbf16>, vector<16x25xf32> -> vector<16x25xf32>
    %13 = arith.maximumf %3, %6 : vector<16x25xf32>
    %14 = arith.maximumf %9, %12 : vector<16x25xf32>
    %15 = arith.maximumf %13, %14 : vector<16x25xf32>
    %c0_17 = arith.constant 0 : index
    %c0_18 = arith.constant 0 : index
    %16 = vector.load %arg3[%c0_17, %c0_18] : memref<16x1xf32, #tpu.memory_space<vmem>>, vector<16x1xf32>
    %17 = vector.broadcast %16 : vector<16x1xf32> to vector<16x25xf32>
    %18 = arith.addf %15, %17 : vector<16x25xf32>
    %cst_19 = arith.constant 0.000000e+00 : f32
    %19 = vector.broadcast %cst_19 : f32 to vector<16x25xf32>
    %20 = arith.maximumf %18, %19 : vector<16x25xf32>
    %21 = vector.extract_strided_slice %20 {offsets = [0, 0], sizes = [1, 25], strides = [1, 1]} : vector<16x25xf32> to vector<1x25xf32>
    %c0_20 = arith.constant 0 : index
    %c0_21 = arith.constant 0 : index
    %c0_22 = arith.constant 0 : index
    %22 = vector.load %arg4[%c0_20, %c0_21, %c0_22] : memref<16x25x128xf32, #tpu.memory_space<vmem>>, vector<1x25x128xf32>
    %23 = vector.shape_cast %22 : vector<1x25x128xf32> to vector<25x128xf32>
    %cst_23 = arith.constant dense<0.000000e+00> : vector<1x128xf32>
    %24 = tpu.matmul %21, %23, %cst_23 {dimension_numbers = #tpu.dot_dimension_numbers<[1], [0], [0], [1], [0, 0, 1, 1], [], []>} : vector<1x25xf32>, vector<25x128xf32>, vector<1x128xf32> -> vector<1x128xf32>
    %25 = vector.extract_strided_slice %20 {offsets = [1, 0], sizes = [1, 25], strides = [1, 1]} : vector<16x25xf32> to vector<1x25xf32>
    %c1_24 = arith.constant 1 : index
    %c0_25 = arith.constant 0 : index
    %c0_26 = arith.constant 0 : index
    %26 = vector.load %arg4[%c1_24, %c0_25, %c0_26] : memref<16x25x128xf32, #tpu.memory_space<vmem>>, vector<1x25x128xf32>
    %27 = vector.shape_cast %26 : vector<1x25x128xf32> to vector<25x128xf32>
    %cst_27 = arith.constant dense<0.000000e+00> : vector<1x128xf32>
    %28 = tpu.matmul %25, %27, %cst_27 {dimension_numbers = #tpu.dot_dimension_numbers<[1], [0], [0], [1], [0, 0, 1, 1], [], []>} : vector<1x25xf32>, vector<25x128xf32>, vector<1x128xf32> -> vector<1x128xf32>
    %29 = vector.extract_strided_slice %20 {offsets = [2, 0], sizes = [1, 25], strides = [1, 1]} : vector<16x25xf32> to vector<1x25xf32>
    %c2_28 = arith.constant 2 : index
    %c0_29 = arith.constant 0 : index
    %c0_30 = arith.constant 0 : index
    %30 = vector.load %arg4[%c2_28, %c0_29, %c0_30] : memref<16x25x128xf32, #tpu.memory_space<vmem>>, vector<1x25x128xf32>
    %31 = vector.shape_cast %30 : vector<1x25x128xf32> to vector<25x128xf32>
    %cst_31 = arith.constant dense<0.000000e+00> : vector<1x128xf32>
    %32 = tpu.matmul %29, %31, %cst_31 {dimension_numbers = #tpu.dot_dimension_numbers<[1], [0], [0], [1], [0, 0, 1, 1], [], []>} : vector<1x25xf32>, vector<25x128xf32>, vector<1x128xf32> -> vector<1x128xf32>
    %33 = vector.extract_strided_slice %20 {offsets = [3, 0], sizes = [1, 25], strides = [1, 1]} : vector<16x25xf32> to vector<1x25xf32>
    %c3_32 = arith.constant 3 : index
    %c0_33 = arith.constant 0 : index
    %c0_34 = arith.constant 0 : index
    %34 = vector.load %arg4[%c3_32, %c0_33, %c0_34] : memref<16x25x128xf32, #tpu.memory_space<vmem>>, vector<1x25x128xf32>
    %35 = vector.shape_cast %34 : vector<1x25x128xf32> to vector<25x128xf32>
    %cst_35 = arith.constant dense<0.000000e+00> : vector<1x128xf32>
    %36 = tpu.matmul %33, %35, %cst_35 {dimension_numbers = #tpu.dot_dimension_numbers<[1], [0], [0], [1], [0, 0, 1, 1], [], []>} : vector<1x25xf32>, vector<25x128xf32>, vector<1x128xf32> -> vector<1x128xf32>
    %37 = vector.extract_strided_slice %20 {offsets = [4, 0], sizes = [1, 25], strides = [1, 1]} : vector<16x25xf32> to vector<1x25xf32>
    %c4 = arith.constant 4 : index
    %c0_36 = arith.constant 0 : index
    %c0_37 = arith.constant 0 : index
    %38 = vector.load %arg4[%c4, %c0_36, %c0_37] : memref<16x25x128xf32, #tpu.memory_space<vmem>>, vector<1x25x128xf32>
    %39 = vector.shape_cast %38 : vector<1x25x128xf32> to vector<25x128xf32>
    %cst_38 = arith.constant dense<0.000000e+00> : vector<1x128xf32>
    %40 = tpu.matmul %37, %39, %cst_38 {dimension_numbers = #tpu.dot_dimension_numbers<[1], [0], [0], [1], [0, 0, 1, 1], [], []>} : vector<1x25xf32>, vector<25x128xf32>, vector<1x128xf32> -> vector<1x128xf32>
    %41 = vector.extract_strided_slice %20 {offsets = [5, 0], sizes = [1, 25], strides = [1, 1]} : vector<16x25xf32> to vector<1x25xf32>
    %c5 = arith.constant 5 : index
    %c0_39 = arith.constant 0 : index
    %c0_40 = arith.constant 0 : index
    %42 = vector.load %arg4[%c5, %c0_39, %c0_40] : memref<16x25x128xf32, #tpu.memory_space<vmem>>, vector<1x25x128xf32>
    %43 = vector.shape_cast %42 : vector<1x25x128xf32> to vector<25x128xf32>
    %cst_41 = arith.constant dense<0.000000e+00> : vector<1x128xf32>
    %44 = tpu.matmul %41, %43, %cst_41 {dimension_numbers = #tpu.dot_dimension_numbers<[1], [0], [0], [1], [0, 0, 1, 1], [], []>} : vector<1x25xf32>, vector<25x128xf32>, vector<1x128xf32> -> vector<1x128xf32>
    %45 = vector.extract_strided_slice %20 {offsets = [6, 0], sizes = [1, 25], strides = [1, 1]} : vector<16x25xf32> to vector<1x25xf32>
    %c6 = arith.constant 6 : index
    %c0_42 = arith.constant 0 : index
    %c0_43 = arith.constant 0 : index
    %46 = vector.load %arg4[%c6, %c0_42, %c0_43] : memref<16x25x128xf32, #tpu.memory_space<vmem>>, vector<1x25x128xf32>
    %47 = vector.shape_cast %46 : vector<1x25x128xf32> to vector<25x128xf32>
    %cst_44 = arith.constant dense<0.000000e+00> : vector<1x128xf32>
    %48 = tpu.matmul %45, %47, %cst_44 {dimension_numbers = #tpu.dot_dimension_numbers<[1], [0], [0], [1], [0, 0, 1, 1], [], []>} : vector<1x25xf32>, vector<25x128xf32>, vector<1x128xf32> -> vector<1x128xf32>
    %49 = vector.extract_strided_slice %20 {offsets = [7, 0], sizes = [1, 25], strides = [1, 1]} : vector<16x25xf32> to vector<1x25xf32>
    %c7 = arith.constant 7 : index
    %c0_45 = arith.constant 0 : index
    %c0_46 = arith.constant 0 : index
    %50 = vector.load %arg4[%c7, %c0_45, %c0_46] : memref<16x25x128xf32, #tpu.memory_space<vmem>>, vector<1x25x128xf32>
    %51 = vector.shape_cast %50 : vector<1x25x128xf32> to vector<25x128xf32>
    %cst_47 = arith.constant dense<0.000000e+00> : vector<1x128xf32>
    %52 = tpu.matmul %49, %51, %cst_47 {dimension_numbers = #tpu.dot_dimension_numbers<[1], [0], [0], [1], [0, 0, 1, 1], [], []>} : vector<1x25xf32>, vector<25x128xf32>, vector<1x128xf32> -> vector<1x128xf32>
    %53 = vector.extract_strided_slice %20 {offsets = [8, 0], sizes = [1, 25], strides = [1, 1]} : vector<16x25xf32> to vector<1x25xf32>
    %c8 = arith.constant 8 : index
    %c0_48 = arith.constant 0 : index
    %c0_49 = arith.constant 0 : index
    %54 = vector.load %arg4[%c8, %c0_48, %c0_49] : memref<16x25x128xf32, #tpu.memory_space<vmem>>, vector<1x25x128xf32>
    %55 = vector.shape_cast %54 : vector<1x25x128xf32> to vector<25x128xf32>
    %cst_50 = arith.constant dense<0.000000e+00> : vector<1x128xf32>
    %56 = tpu.matmul %53, %55, %cst_50 {dimension_numbers = #tpu.dot_dimension_numbers<[1], [0], [0], [1], [0, 0, 1, 1], [], []>} : vector<1x25xf32>, vector<25x128xf32>, vector<1x128xf32> -> vector<1x128xf32>
    %57 = vector.extract_strided_slice %20 {offsets = [9, 0], sizes = [1, 25], strides = [1, 1]} : vector<16x25xf32> to vector<1x25xf32>
    %c9 = arith.constant 9 : index
    %c0_51 = arith.constant 0 : index
    %c0_52 = arith.constant 0 : index
    %58 = vector.load %arg4[%c9, %c0_51, %c0_52] : memref<16x25x128xf32, #tpu.memory_space<vmem>>, vector<1x25x128xf32>
    %59 = vector.shape_cast %58 : vector<1x25x128xf32> to vector<25x128xf32>
    %cst_53 = arith.constant dense<0.000000e+00> : vector<1x128xf32>
    %60 = tpu.matmul %57, %59, %cst_53 {dimension_numbers = #tpu.dot_dimension_numbers<[1], [0], [0], [1], [0, 0, 1, 1], [], []>} : vector<1x25xf32>, vector<25x128xf32>, vector<1x128xf32> -> vector<1x128xf32>
    %61 = vector.extract_strided_slice %20 {offsets = [10, 0], sizes = [1, 25], strides = [1, 1]} : vector<16x25xf32> to vector<1x25xf32>
    %c10 = arith.constant 10 : index
    %c0_54 = arith.constant 0 : index
    %c0_55 = arith.constant 0 : index
    %62 = vector.load %arg4[%c10, %c0_54, %c0_55] : memref<16x25x128xf32, #tpu.memory_space<vmem>>, vector<1x25x128xf32>
    %63 = vector.shape_cast %62 : vector<1x25x128xf32> to vector<25x128xf32>
    %cst_56 = arith.constant dense<0.000000e+00> : vector<1x128xf32>
    %64 = tpu.matmul %61, %63, %cst_56 {dimension_numbers = #tpu.dot_dimension_numbers<[1], [0], [0], [1], [0, 0, 1, 1], [], []>} : vector<1x25xf32>, vector<25x128xf32>, vector<1x128xf32> -> vector<1x128xf32>
    %65 = vector.extract_strided_slice %20 {offsets = [11, 0], sizes = [1, 25], strides = [1, 1]} : vector<16x25xf32> to vector<1x25xf32>
    %c11 = arith.constant 11 : index
    %c0_57 = arith.constant 0 : index
    %c0_58 = arith.constant 0 : index
    %66 = vector.load %arg4[%c11, %c0_57, %c0_58] : memref<16x25x128xf32, #tpu.memory_space<vmem>>, vector<1x25x128xf32>
    %67 = vector.shape_cast %66 : vector<1x25x128xf32> to vector<25x128xf32>
    %cst_59 = arith.constant dense<0.000000e+00> : vector<1x128xf32>
    %68 = tpu.matmul %65, %67, %cst_59 {dimension_numbers = #tpu.dot_dimension_numbers<[1], [0], [0], [1], [0, 0, 1, 1], [], []>} : vector<1x25xf32>, vector<25x128xf32>, vector<1x128xf32> -> vector<1x128xf32>
    %69 = vector.extract_strided_slice %20 {offsets = [12, 0], sizes = [1, 25], strides = [1, 1]} : vector<16x25xf32> to vector<1x25xf32>
    %c12 = arith.constant 12 : index
    %c0_60 = arith.constant 0 : index
    %c0_61 = arith.constant 0 : index
    %70 = vector.load %arg4[%c12, %c0_60, %c0_61] : memref<16x25x128xf32, #tpu.memory_space<vmem>>, vector<1x25x128xf32>
    %71 = vector.shape_cast %70 : vector<1x25x128xf32> to vector<25x128xf32>
    %cst_62 = arith.constant dense<0.000000e+00> : vector<1x128xf32>
    %72 = tpu.matmul %69, %71, %cst_62 {dimension_numbers = #tpu.dot_dimension_numbers<[1], [0], [0], [1], [0, 0, 1, 1], [], []>} : vector<1x25xf32>, vector<25x128xf32>, vector<1x128xf32> -> vector<1x128xf32>
    %73 = vector.extract_strided_slice %20 {offsets = [13, 0], sizes = [1, 25], strides = [1, 1]} : vector<16x25xf32> to vector<1x25xf32>
    %c13 = arith.constant 13 : index
    %c0_63 = arith.constant 0 : index
    %c0_64 = arith.constant 0 : index
    %74 = vector.load %arg4[%c13, %c0_63, %c0_64] : memref<16x25x128xf32, #tpu.memory_space<vmem>>, vector<1x25x128xf32>
    %75 = vector.shape_cast %74 : vector<1x25x128xf32> to vector<25x128xf32>
    %cst_65 = arith.constant dense<0.000000e+00> : vector<1x128xf32>
    %76 = tpu.matmul %73, %75, %cst_65 {dimension_numbers = #tpu.dot_dimension_numbers<[1], [0], [0], [1], [0, 0, 1, 1], [], []>} : vector<1x25xf32>, vector<25x128xf32>, vector<1x128xf32> -> vector<1x128xf32>
    %77 = vector.extract_strided_slice %20 {offsets = [14, 0], sizes = [1, 25], strides = [1, 1]} : vector<16x25xf32> to vector<1x25xf32>
    %c14 = arith.constant 14 : index
    %c0_66 = arith.constant 0 : index
    %c0_67 = arith.constant 0 : index
    %78 = vector.load %arg4[%c14, %c0_66, %c0_67] : memref<16x25x128xf32, #tpu.memory_space<vmem>>, vector<1x25x128xf32>
    %79 = vector.shape_cast %78 : vector<1x25x128xf32> to vector<25x128xf32>
    %cst_68 = arith.constant dense<0.000000e+00> : vector<1x128xf32>
    %80 = tpu.matmul %77, %79, %cst_68 {dimension_numbers = #tpu.dot_dimension_numbers<[1], [0], [0], [1], [0, 0, 1, 1], [], []>} : vector<1x25xf32>, vector<25x128xf32>, vector<1x128xf32> -> vector<1x128xf32>
    %81 = vector.extract_strided_slice %20 {offsets = [15, 0], sizes = [1, 25], strides = [1, 1]} : vector<16x25xf32> to vector<1x25xf32>
    %c15 = arith.constant 15 : index
    %c0_69 = arith.constant 0 : index
    %c0_70 = arith.constant 0 : index
    %82 = vector.load %arg4[%c15, %c0_69, %c0_70] : memref<16x25x128xf32, #tpu.memory_space<vmem>>, vector<1x25x128xf32>
    %83 = vector.shape_cast %82 : vector<1x25x128xf32> to vector<25x128xf32>
    %cst_71 = arith.constant dense<0.000000e+00> : vector<1x128xf32>
    %84 = tpu.matmul %81, %83, %cst_71 {dimension_numbers = #tpu.dot_dimension_numbers<[1], [0], [0], [1], [0, 0, 1, 1], [], []>} : vector<1x25xf32>, vector<25x128xf32>, vector<1x128xf32> -> vector<1x128xf32>
    %85 = arith.addf %24, %28 : vector<1x128xf32>
    %86 = arith.addf %32, %36 : vector<1x128xf32>
    %87 = arith.addf %40, %44 : vector<1x128xf32>
    %88 = arith.addf %48, %52 : vector<1x128xf32>
    %89 = arith.addf %56, %60 : vector<1x128xf32>
    %90 = arith.addf %64, %68 : vector<1x128xf32>
    %91 = arith.addf %72, %76 : vector<1x128xf32>
    %92 = arith.addf %80, %84 : vector<1x128xf32>
    %93 = arith.addf %85, %86 : vector<1x128xf32>
    %94 = arith.addf %87, %88 : vector<1x128xf32>
    %95 = arith.addf %89, %90 : vector<1x128xf32>
    %96 = arith.addf %91, %92 : vector<1x128xf32>
    %97 = arith.addf %93, %94 : vector<1x128xf32>
    %98 = arith.addf %95, %96 : vector<1x128xf32>
    %99 = arith.addf %97, %98 : vector<1x128xf32>
    %c0_72 = arith.constant 0 : index
    %c0_73 = arith.constant 0 : index
    %100 = vector.load %arg5[%c0_72, %c0_73] : memref<1x128xf32, #tpu.memory_space<vmem>>, vector<1x128xf32>
    %101 = arith.addf %99, %100 : vector<1x128xf32>
    %cst_74 = arith.constant 0.000000e+00 : f32
    %102 = vector.broadcast %cst_74 : f32 to vector<1x128xf32>
    %103 = arith.maximumf %101, %102 : vector<1x128xf32>
    %c0_75 = arith.constant 0 : index
    %c0_76 = arith.constant 0 : index
    %104 = vector.load %arg6[%c0_75, %c0_76] : memref<128x128xf32, #tpu.memory_space<vmem>>, vector<128x128xf32>
    %cst_77 = arith.constant dense<0.000000e+00> : vector<1x128xf32>
    %105 = tpu.matmul %103, %104, %cst_77 {dimension_numbers = #tpu.dot_dimension_numbers<[1], [0], [0], [1], [0, 0, 1, 1], [], []>} : vector<1x128xf32>, vector<128x128xf32>, vector<1x128xf32> -> vector<1x128xf32>
    %c0_78 = arith.constant 0 : index
    %c0_79 = arith.constant 0 : index
    %106 = vector.load %arg7[%c0_78, %c0_79] : memref<1x128xf32, #tpu.memory_space<vmem>>, vector<1x128xf32>
    %107 = arith.addf %105, %106 : vector<1x128xf32>
    %cst_80 = arith.constant 0.000000e+00 : f32
    %108 = vector.broadcast %cst_80 : f32 to vector<1x128xf32>
    %109 = arith.maximumf %107, %108 : vector<1x128xf32>
    %c0_81 = arith.constant 0 : index
    %c0_82 = arith.constant 0 : index
    %110 = vector.load %arg8[%c0_81, %c0_82] : memref<128x128xf32, #tpu.memory_space<vmem>>, vector<128x128xf32>
    %cst_83 = arith.constant dense<0.000000e+00> : vector<1x128xf32>
    %111 = tpu.matmul %109, %110, %cst_83 {dimension_numbers = #tpu.dot_dimension_numbers<[1], [0], [0], [1], [0, 0, 1, 1], [], []>} : vector<1x128xf32>, vector<128x128xf32>, vector<1x128xf32> -> vector<1x128xf32>
    %c0_84 = arith.constant 0 : index
    %c0_85 = arith.constant 0 : index
    %112 = vector.load %arg9[%c0_84, %c0_85] : memref<1x128xf32, #tpu.memory_space<vmem>>, vector<1x128xf32>
    %113 = arith.addf %111, %112 : vector<1x128xf32>
    %c0_86 = arith.constant 0 : index
    %c0_87 = arith.constant 0 : index
    %c0_88 = arith.constant 0 : index
    %114 = vector.load %arg10[%c0_86, %c0_87, %c0_88] : memref<1x1x128xf32, #tpu.memory_space<vmem>>, vector<1x1x128xf32>
    %115 = vector.shape_cast %114 : vector<1x1x128xf32> to vector<1x128xf32>
    %116 = vector.shape_cast %113 : vector<1x128xf32> to vector<1x1x128xf32>
    tpu.vector_store %arg10[%c0_86, %c0_87, %c0_88], %116 {strides = array<i32>} : memref<1x1x128xf32, #tpu.memory_space<vmem>>, vector<1x1x128xf32>,
    return
  }
  func.func @transform_0(%arg0: i32) -> (i32, i32, i32, i32) {
    %c0_i32 = arith.constant 0 : i32
    %c0_i32_0 = arith.constant 0 : i32
    %c0_i32_1 = arith.constant 0 : i32
    %c0_i32_2 = arith.constant 0 : i32
    return %arg0, %c0_i32, %c0_i32_0, %c0_i32_1 : i32, i32, i32, i32
  }
  func.func @transform_1(%arg0: i32) -> (i32, i32) {
    %c0_i32 = arith.constant 0 : i32
    %c0_i32_0 = arith.constant 0 : i32
    %c0_i32_1 = arith.constant 0 : i32
    return %c0_i32, %c0_i32_0 : i32, i32
  }
  func.func @transform_2(%arg0: i32) -> (i32, i32) {
    %c0_i32 = arith.constant 0 : i32
    %c0_i32_0 = arith.constant 0 : i32
    %c0_i32_1 = arith.constant 0 : i32
    return %c0_i32, %c0_i32_0 : i32, i32
  }
  func.func @transform_3(%arg0: i32) -> (i32, i32, i32) {
    %c0_i32 = arith.constant 0 : i32
    %c0_i32_0 = arith.constant 0 : i32
    %c0_i32_1 = arith.constant 0 : i32
    %c0_i32_2 = arith.constant 0 : i32
    return %c0_i32, %c0_i32_0, %c0_i32_1 : i32, i32, i32
  }
  func.func @transform_4(%arg0: i32) -> (i32, i32) {
    %c0_i32 = arith.constant 0 : i32
    %c0_i32_0 = arith.constant 0 : i32
    %c0_i32_1 = arith.constant 0 : i32
    return %c0_i32, %c0_i32_0 : i32, i32
  }
  func.func @transform_5(%arg0: i32) -> (i32, i32) {
    %c0_i32 = arith.constant 0 : i32
    %c0_i32_0 = arith.constant 0 : i32
    %c0_i32_1 = arith.constant 0 : i32
    return %c0_i32, %c0_i32_0 : i32, i32
  }
  func.func @transform_6(%arg0: i32) -> (i32, i32) {
    %c0_i32 = arith.constant 0 : i32
    %c0_i32_0 = arith.constant 0 : i32
    %c0_i32_1 = arith.constant 0 : i32
    return %c0_i32, %c0_i32_0 : i32, i32
  }
  func.func @transform_7(%arg0: i32) -> (i32, i32) {
    %c0_i32 = arith.constant 0 : i32
    %c0_i32_0 = arith.constant 0 : i32
    %c0_i32_1 = arith.constant 0 : i32
    return %c0_i32, %c0_i32_0 : i32, i32
  }
  func.func @transform_8(%arg0: i32) -> (i32, i32) {
    %c0_i32 = arith.constant 0 : i32
    %c0_i32_0 = arith.constant 0 : i32
    %c0_i32_1 = arith.constant 0 : i32
    return %c0_i32, %c0_i32_0 : i32, i32
  }
  func.func @transform_9(%arg0: i32) -> (i32, i32, i32) {
    %c0_i32 = arith.constant 0 : i32
    %c0_i32_0 = arith.constant 0 : i32
    %c0_i32_1 = arith.constant 0 : i32
    return %arg0, %c0_i32, %c0_i32_0 : i32, i32, i32
  }
}

</mosaic_0001>

<bundles_post_ra>
// kernel: simple_cnn_forward.2
= control target key start
LH: loop header
LB: loop body
LE: loop exit
PB: predicated region body
PF: predicated region fallthrough
CT: control target
= control target key end

     0   :  { %s865_s12 = smov 0   ;;  %s953_s0 = inlined_call_operand.vmem [shape: bf16[2,4,75,196], index: 0, kind: input, shape index: {}]   ;;  %s954_s1 = inlined_call_operand.vmem [shape: bf16[6,75], index: 1, kind: input, shape index: {}]   ;;  %s955_s2 = inlined_call_operand.vmem [shape: f32[6,1], index: 2, kind: input, shape index: {}]   ;;  %s956_s3 = inlined_call_operand.vmem [shape: f32[2,6,196], index: 3, kind: output, shape index: {}]  }
   0x1 LB: > { %s678_s13 = sadd.s32 4294967295, %s841_s12   ;;  %p682_p0 = scmp.ge.s32.totalorder %s841_s12, 1  ;;  %s841_s12 = sphi %s865_s12, %s13_s12  }
   0x2   : > { %p137_p1 = scmp.lt.s32.totalorder %s841_s12, 3 }
   0x4   : > { %p138_p2 = pnand %p682_p0, %p137_p1 }
   0x5   : > { %p161_p3 = scmp.lt.s32.totalorder (!%p138_p2), %s678_s13, 1 }
   0x6   : > { %141 = sbr.rel (%p138_p2) target bundleno = 262 (0x106), region = 32 }
   0xb   : > { %vm235_vm0 = vcmask 1044480   ;;  %v843_v0 = vmov 0   ;;  %v610_v1 = vld [vmem:[%s955_s2] sm:$0x3f]  ;;  %s958_s13 = smov (!%p161_p3, %s678_s13), 1  ;;  %vm236_vm1 = vcmask 1045504  }
   0xc   : > { %277 = vmatprep.mubr.bf16.mxu0 %v843_v0  ;;  %383 = vmatprep.mubr.bf16.mxu1 %v843_v0  ;;  %v844_v2 = vmov 65535   ;;  %s763_s16 = smul.u32 320, %s958_s13  ;;  %v172_v35 = vld [vmem:[%s954_s1] sm:$0x7]  ;;  %vm231_vm2 = vcmask 613376   ;;  %s762_s22 = sshll.u32 %s958_s13, 4 }
   0xd   : > { %774 = vset.pattern.permute.xlu0 %v843_v0  ;;  %v237_v3 = vsel %vm235_vm0, 4294967295, %v844_v2  ;;  %s170_s25 = scalar_lea.vmem %s956_s3, %s762_s22  ;;  %vm621_vm3 = vcmask 553984  }
   0xe   : > { %613 = vperm.xlu0 %774, %v610_v1   ;;  %s885_s19 = scalar_lea.vmem %s953_s0, %s763_s16  ;;  %v887_v4 = vsel %vm236_vm1, %v237_v3, 0 }
   0xf   : > { %v775_v5 = vld [vmem:[%s885_s19 + $0x44] ss:$8 sps:$4 sm:$0x3f]   ;;  %v777_v6 = vld [vmem:[%s885_s19 + $0x94] ss:$8 sps:$4 sm:$0x3f]  }
  0x10   : > { %v243_v7 = vand.u32 %v775_v5, %v887_v4  ;;  %v779_v8 = vld [vmem:[%s885_s19 + $0x40] ss:$8 sps:$4 sm:$0x3f]   ;;  %v780_v9 = vld [vmem:[%s885_s19 + $0x90] ss:$8 sps:$4 sm:$0x3f]   ;;  %v349_v10 = vand.u32 %v777_v6, %v887_v4 }
  0x11   : > { %v781_v11 = vld [vmem:[%s885_s19 + $0x34] ss:$8 sps:$4 sm:$0xff]   ;;  %v240_v12 = vand.u32 %v779_v8, %v887_v4  ;;  %v346_v13 = vand.u32 %v780_v9, %v887_v4  ;;  %v783_v14 = vld [vmem:[%s885_s19 + $0x84] ss:$8 sps:$4 sm:$0xff]   ;;  %v785_v15 = vld [vmem:[%s885_s19 + $0x30] ss:$8 sps:$4 sm:$0xff]  }
  0x12   : > { %251 = vmatprep.subr.bf16.mxu0 %v243_v7  ;;  %357 = vmatprep.subr.bf16.mxu1 %v349_v10  ;;  %v786_v16 = vld [vmem:[%s885_s19 + $0x80] ss:$8 sps:$4 sm:$0xff]   ;;  %v787_v17 = vld [vmem:[%s885_s19 + $0x24] ss:$8 sps:$4 sm:$0xff]   ;;  %v789_v18 = vld [vmem:[%s885_s19 + $0x74] ss:$8 sps:$4 sm:$0xff]  }
  0x13   : > { %252 = vmatpush1.bf16.msra.mxu0 %v240_v12  ;;  %358 = vmatpush1.bf16.msra.mxu1 %v346_v13  ;;  %v791_v19 = vld [vmem:[%s885_s19 + $0x20] ss:$8 sps:$4 sm:$0xff]   ;;  %v792_v20 = vld [vmem:[%s885_s19 + $0x70] ss:$8 sps:$4 sm:$0xff]   ;;  %v793_v21 = vld [vmem:[%s885_s19 + $0x14] ss:$8 sps:$4 sm:$0xff]  }
  0x14   : > { %253 = vmatprep.subr.bf16.mxu0 %v781_v11  ;;  %359 = vmatprep.subr.bf16.mxu1 %v783_v14  ;;  %v795_v22 = vld [vmem:[%s885_s19 + $0x64] ss:$8 sps:$4 sm:$0xff]   ;;  %v797_v23 = vld [vmem:[%s885_s19 + $0x10] ss:$8 sps:$4 sm:$0xff]   ;;  %v798_v24 = vld [vmem:[%s885_s19 + $0x60] ss:$8 sps:$4 sm:$0xff]  }
  0x15   : > { %v799_v25 = vld [vmem:[%s885_s19 + $0x4] ss:$8 sps:$4 sm:$0xff]   ;;  %v801_v26 = vld [vmem:[%s885_s19 + $0x54] ss:$8 sps:$4 sm:$0xff]   ;;  %v803_v28 = vld [vmem:[%s885_s19] ss:$8 sps:$4 sm:$0xff]  }
  0x16   : > { %v807_v27 = vld [vmem:[%s885_s19 + $0xe4] ss:$8 sps:$4 sm:$0x3f]   ;;  %v810_v29 = vld [vmem:[%s885_s19 + $0x134] ss:$8 sps:$4 sm:$0x3f]  }
  0x17   : > { %254 = vmatpush1.bf16.msra.mxu0 %v785_v15  ;;  %360 = vmatpush1.bf16.msra.mxu1 %v786_v16  ;;  %v804_v30 = vld [vmem:[%s885_s19 + $0x50] ss:$8 sps:$4 sm:$0xff]   ;;  %v805_v31 = vld [vmem:[%s885_s19 + $0xe0] ss:$8 sps:$4 sm:$0x3f]   ;;  %v455_v33 = vand.u32 %v807_v27, %v887_v4  ;;  %v561_v34 = vand.u32 %v810_v29, %v887_v4 }
  0x18   : > { %255 = vmatprep.subr.bf16.mxu0 %v787_v17  ;;  %361 = vmatprep.subr.bf16.mxu1 %v789_v18  ;;  %v808_v32 = vld [vmem:[%s885_s19 + $0x130] ss:$8 sps:$4 sm:$0x3f]   ;;  %v452_v36 = vand.u32 %v805_v31, %v887_v4  ;;  %v813_v38 = vld [vmem:[%s885_s19 + $0xd4] ss:$8 sps:$4 sm:$0xff]  }
  0x19   : > { %v558_v37 = vand.u32 %v808_v32, %v887_v4  ;;  %v816_v39 = vld [vmem:[%s885_s19 + $0x124] ss:$8 sps:$4 sm:$0xff]   ;;  %v811_v40 = vld [vmem:[%s885_s19 + $0xd0] ss:$8 sps:$4 sm:$0xff]   ;;  %v814_v41 = vld [vmem:[%s885_s19 + $0x120] ss:$8 sps:$4 sm:$0xff]  }
  0x1a   : > { %v819_v42 = vld [vmem:[%s885_s19 + $0xc4] ss:$8 sps:$4 sm:$0xff]   ;;  %v822_v43 = vld [vmem:[%s885_s19 + $0x114] ss:$8 sps:$4 sm:$0xff]   ;;  %v817_v44 = vld [vmem:[%s885_s19 + $0xc0] ss:$8 sps:$4 sm:$0xff]  }
  0x1b   : > { %256 = vmatpush1.bf16.msra.mxu0 %v791_v19  ;;  %362 = vmatpush1.bf16.msra.mxu1 %v792_v20  ;;  %v820_v45 = vld [vmem:[%s885_s19 + $0x110] ss:$8 sps:$4 sm:$0xff]   ;;  %v825_v46 = vld [vmem:[%s885_s19 + $0xb4] ss:$8 sps:$4 sm:$0xff]   ;;  %v828_v47 = vld [vmem:[%s885_s19 + $0x104] ss:$8 sps:$4 sm:$0xff]  }
  0x1c   : > { %257 = vmatprep.subr.bf16.mxu0 %v793_v21  ;;  %363 = vmatprep.subr.bf16.mxu1 %v795_v22  ;;  %v823_v48 = vld [vmem:[%s885_s19 + $0xb0] ss:$8 sps:$4 sm:$0xff]   ;;  %v826_v49 = vld [vmem:[%s885_s19 + $0x100] ss:$8 sps:$4 sm:$0xff]   ;;  %v831_v50 = vld [vmem:[%s885_s19 + $0xa4] ss:$8 sps:$4 sm:$0xff]  }
  0x1d   : > { %v834_v51 = vld [vmem:[%s885_s19 + $0xf4] ss:$8 sps:$4 sm:$0xff]   ;;  %v829_v52 = vld [vmem:[%s885_s19 + $0xa0] ss:$8 sps:$4 sm:$0xff]   ;;  %v832_v53 = vld [vmem:[%s885_s19 + $0xf0] ss:$8 sps:$4 sm:$0xff]  }
  0x1f   : > { %258 = vmatpush1.bf16.msra.mxu0 %v797_v23  ;;  %364 = vmatpush1.bf16.msra.mxu1 %v798_v24 }
  0x20   : > { %259 = vmatprep.subr.bf16.mxu0 %v799_v25  ;;  %365 = vmatprep.subr.bf16.mxu1 %v801_v26 }
  0x23   : > { %260 = vmatpush1.bf16.msra.mxu0 %v803_v28  ;;  %366 = vmatpush1.bf16.msra.mxu1 %v804_v30 }
  0x24   : > { %463 = vmatprep.subr.bf16.mxu0 %v455_v33  ;;  %569 = vmatprep.subr.bf16.mxu1 %v561_v34 }
  0x26   : > { %696 = vmatmul.mubr.msk.bf16.vlgmr.msra.gmra.mxu0 %vm231_vm2, %v172_v35  ;;  %717 = vmatmul.mubr.msk.bf16.vlgmr.msra.gmra.mxu1 %vm231_vm2, %v172_v35 }
  0x27   : > { %464 = vmatpush1.bf16.msra.mxu0 %v452_v36  ;;  %570 = vmatpush1.bf16.msra.mxu1 %v558_v37 }
  0x28   : > { %465 = vmatprep.subr.bf16.mxu0 %v813_v38  ;;  %571 = vmatprep.subr.bf16.mxu1 %v816_v39 }
  0x29   : > { %489 = vmatprep.mubr.bf16.mxu0 %v843_v0  ;;  %595 = vmatprep.mubr.bf16.mxu1 %v843_v0 }
  0x2b   : > { %466 = vmatpush1.bf16.msra.mxu0 %v811_v40  ;;  %572 = vmatpush1.bf16.msra.mxu1 %v814_v41 }
  0x2c   : > { %467 = vmatprep.subr.bf16.mxu0 %v819_v42  ;;  %573 = vmatprep.subr.bf16.mxu1 %v822_v43 }
  0x2f   : > { %468 = vmatpush1.bf16.msra.mxu0 %v817_v44  ;;  %574 = vmatpush1.bf16.msra.mxu1 %v820_v45 }
  0x30   : > { %469 = vmatprep.subr.bf16.mxu0 %v825_v46  ;;  %575 = vmatprep.subr.bf16.mxu1 %v828_v47 }
  0x33   : > { %470 = vmatpush1.bf16.msra.mxu0 %v823_v48  ;;  %576 = vmatpush1.bf16.msra.mxu1 %v826_v49 }
  0x34   : > { %471 = vmatprep.subr.bf16.mxu0 %v831_v50  ;;  %577 = vmatprep.subr.bf16.mxu1 %v834_v51 }
  0x37   : > { %472 = vmatpush1.bf16.msra.mxu0 %v829_v52  ;;  %578 = vmatpush1.bf16.msra.mxu1 %v832_v53 }
  0x3a   : > { %738 = vmatmul.mubr.msk.bf16.vlgmr.msra.gmra.mxu0 %vm231_vm2, %v172_v35  ;;  %759 = vmatmul.mubr.msk.bf16.vlgmr.msra.gmra.mxu1 %vm231_vm2, %v172_v35 }
  0x89   : > { %v614_v2 = vpop.permute.xlu0 %613 }
  0xe6   : > { %v279_v54 = vpop.f32.mrf.mxu0  ;;  %v385_v55 = vpop.f32.mrf.mxu1 }
  0xe7   : > { %v604_v0 = vmax.f32 %v279_v54, %v385_v55 }
  0xe8   : > { %v281_v56 = vpop.f32.mrf.mxu0  ;;  %v387_v57 = vpop.f32.mrf.mxu1 }
  0xe9   : > { %v605_v5 = vmax.f32 %v281_v56, %v387_v57 }
  0xea   : > { %v283_v58 = vpop.f32.mrf.mxu0  ;;  %v389_v59 = vpop.f32.mrf.mxu1 }
  0xec   : > { %v284_v60 = vpop.f32.mrf.mxu0  ;;  %v390_v61 = vpop.f32.mrf.mxu1 }
  0xfa   : > { %v491_v62 = vpop.f32.mrf.mxu0  ;;  %v597_v63 = vpop.f32.mrf.mxu1 }
  0xfb   : > { %v606_v1 = vmax.f32 %v491_v62, %v597_v63 }
  0xfc   : > { %v493_v3 = vpop.f32.mrf.mxu0  ;;  %v599_v4 = vpop.f32.mrf.mxu1 }
  0xfd   : > { %v607_v6 = vmax.f32 %v493_v3, %v599_v4  ;;  %v608_v7 = vmax.f32 %v604_v0, %v606_v1 }
  0xfe   : > { %v495_v8 = vpop.f32.mrf.mxu0  ;;  %v601_v9 = vpop.f32.mrf.mxu1 }
  0xff   : > { %v609_v10 = vmax.f32 %v605_v5, %v607_v6  ;;  %v616_v11 = vadd.f32 %v614_v2, %v608_v7 }
 0x100   : > { %v496_v12 = vpop.f32.mrf.mxu0  ;;  %v602_v13 = vpop.f32.mrf.mxu1 }
 0x101   : > { %v617_v14 = vadd.f32 %v614_v2, %v609_v10  ;;  %v618_v15 = vmax.f32 %v616_v11, 0.0 }
 0x103   : > { %v619_v16 = vmax.f32 %v617_v14, 0.0  ;;  %620 = vst [vmem:[%s170_s25] sm:$0x3f] %v618_v15 }
 0x105   : > { %622 = vst.msk [vmem:[%s170_s25 + $0x8] sm:$0x3f] %vm621_vm3, %v619_v16 }
 0x106 PF: > { %s13_s12 = sadd.s32 1, %s841_s12  }
 0x107   : > { %p10_p4 = scmp.ge.s32.totalorder %s13_s12, 4  }
 0x109   :  { %12 = sbr.rel (!%p10_p4) target bundleno = 1 (0x1), region = 65 }

// kernel: simple_cnn_forward.3
= control target key start
LH: loop header
LB: loop body
LE: loop exit
PB: predicated region body
PF: predicated region fallthrough
CT: control target
= control target key end

     0   :  { %14 = vsyncpa [#allocation3], 0  ;;  %s3858_s0 = inlined_call_operand.vmem [shape: bf16[2,4,150,25], index: 0, kind: input, shape index: {}]   ;;  %s3859_s1 = inlined_call_operand.vmem [shape: bf16[16,150], index: 1, kind: input, shape index: {}]   ;;  %s3860_s2 = inlined_call_operand.vmem [shape: f32[16,1], index: 2, kind: input, shape index: {}]   ;;  %s3861_s3 = inlined_call_operand.vmem [shape: f32[16,25,128], index: 3, kind: input, shape index: {}]   ;;  %s3862_s4 = inlined_call_operand.vmem [shape: f32[1,128], index: 4, kind: input, shape index: {}]   ;;  %s3863_s5 = inlined_call_operand.vmem [shape: f32[128,128], index: 5, kind: input, shape index: {}]   ;;  %s3864_s6 = inlined_call_operand.vmem [shape: f32[1,128], index: 6, kind: input, shape index: {}]   ;;  %s3865_s7 = inlined_call_operand.vmem [shape: f32[128,128], index: 7, kind: input, shape index: {}]   ;;  %s3866_s8 = inlined_call_operand.vmem [shape: f32[1,128], index: 8, kind: input, shape index: {}]   ;;  %s3867_s9 = inlined_call_operand.hbm [shape: f32[2,1,128], index: 9, kind: output, shape index: {}]  }
   0x1   :  { %16 = vsyncpa [#allocation3 + $0x1], 0  ;;  %s3169_s30 = smov 0   ;;  %s3171_s10 = smov 0  }
   0x2   :  { %s3173_s11 = smov 0   ;;  %s3175_s12 = smov 0  }
   0x3 LB: > { %s3190_s13 = sadd.s32 4294967295, %s3113_s12   ;;  %s2403_s14 = sadd.s32 4294967294, %s3113_s12   ;;  %s3113_s12 = sphi %s3175_s12, %s3873_s12   ;;  %s3109_s11 = sphi %s3173_s11, %s3872_s11   ;;  %s3105_s10 = sphi %s3171_s10, %s3871_s10   ;;  %s3101_s30 = sphi %s3169_s30, %s3870_s30  }
   0x4   : > { %s3194_s15 = sadd.s32 1, %s3113_s12   ;;  %s223_s16 = sadd.s32 1, %s3109_s11 }
   0x5   : > { %s220_s17 = ssub.s32 %s3113_s12, %s3194_s15  ;;  %p233_p0 = scmp.ne.s32.totalorder %s3109_s11, %s3105_s10 }
   0x6   : > { %p221_p1 = scmp.eq.s32.totalorder %s220_s17, 0  ;;  %p234_p2 = scmp.eq.s32.totalorder %s3190_s13, 1 }
   0x7   : > { %p239_p3 = scmp.ne.s32.totalorder %s3105_s10, %s3101_s30  ;;  %p240_p4 = scmp.eq.s32.totalorder %s2403_s14, 1 }
   0x8   : > { %s3205_s18 = scalar_select %p221_p1, %s3109_s11, %s223_s16  }
   0x9   : > { %p3207_p5 = por %p234_p2, %p233_p0  ;;  %p3211_p6 = por %p240_p4, %p239_p3 }
   0xa   : > { %p2406_p7 = scmp.ge.s32.totalorder %s3113_s12, 1  ;;  %p290_p8 = scmp.lt.s32.totalorder %s3113_s12, 3 }
   0xc   : > { %p291_p9 = pnand %p2406_p7, %p290_p8 }
   0xd   : > { %p325_p10 = scmp.lt.s32.totalorder (!%p291_p9), %s3190_s13, 1  ;;  %s2603_s29 = sshll.u32 (!%p291_p9), %s3190_s13, 4 }
   0xe   : > { %294 = sbr.rel (%p291_p9) target bundleno = 986 (0x3da), region = 56  ;;  %s3823_s22 = scalar_lea.hbm (!%p291_p9), %s3867_s9, %s2603_s29 }
  0x13   : > { %vm418_vm0 = vcmask 179200   ;;  %v3115_v0 = vmov 0   ;;  %v3223_v1 = vld [vmem:[%s3859_s1 + $0x4] ss:$8 sps:$4 sm:$0xff]   ;;  %s326_s25 = scalar_select %p325_p10, %s3190_s13, 1  ;;  %vm422_vm1 = vcmask 1042432  }
  0x14   : > { %426 = vmatprep.subr.bf16.mxu0 %v3115_v0  ;;  %547 = vmatprep.subr.bf16.mxu1 %v3115_v0  ;;  %v836_v2 = vld [vmem:[%s3860_s2] sm:$0xff]  ;;  %v837_v3 = vld [vmem:[%s3860_s2 + $0x8] sm:$0xff]  ;;  %v3116_v49 = vmov 0.0   ;;  %v2514_v50 = vld [vmem:[%s3861_s3 + $0x38] sm:$0x1]  ;;  %vm866_vm2 = vcmask 1040384  }
  0x15   : > { %3009 = vset.pattern.permute.xlu0 %v3115_v0  ;;  %2420 = vmatprep.mubr.msk.bf16.mxu0 %vm418_vm0, %v3223_v1  ;;  %s2966_s26 = smul.u32 304, %s326_s25  ;;  %v3285_v26 = vld [vmem:[%s3859_s1] ss:$8 sps:$4 sm:$0xff]   ;;  %v2524_v51 = vld [vmem:[%s3861_s3 + $0x78] sm:$0x1]  ;;  %v2513_v52 = vld [vmem:[%s3861_s3 + $0x30] sm:$0xff] }
  0x16   : > { %2450 = vmatprep.mubr.msk.bf16.mxu1 %vm418_vm0, %v3223_v1  ;;  %840 = vperm.xlu0 %3009, %v836_v2   ;;  %v2523_v53 = vld [vmem:[%s3861_s3 + $0x70] sm:$0xff]  ;;  %v2512_v54 = vld [vmem:[%s3861_s3 + $0x28] sm:$0xff]  ;;  %v2511_v56 = vld [vmem:[%s3861_s3 + $0x20] sm:$0xff]  ;;  %vm3117_vm3 = vmmov 0   ;;  %vm863_vm4 = vcmask 203776   ;;  %s3118_s25 = smov [#allocation2]  }
  0x17   : > { %s3240_s16 = scalar_lea.vmem %s3858_s0, %s2966_s26  ;;  %v2522_v55 = vld [vmem:[%s3861_s3 + $0x68] sm:$0xff]  ;;  %v2521_v57 = vld [vmem:[%s3861_s3 + $0x60] sm:$0xff]  ;;  %s323_s26 = sand.u32 1, %s3105_s10  }
  0x18   : > { %v3010_v4 = vld [vmem:[%s3240_s16 + $0x38] sm:$0xff]   ;;  %v3011_v5 = vld [vmem:[%s3240_s16 + $0x84] sm:$0xff]   ;;  %v3012_v6 = vld [vmem:[%s3240_s16 + $0x30] sm:$0xff]   ;;  %s324_s14 = scalar_lea.vmem [#allocation2], %s323_s26  ;;  %s2336_s23 = scalar_lea.sflag [#allocation3], %s323_s26 }
  0x19   : > { %427 = vmatpush1.bf16.msra.mxu0 %v3010_v4  ;;  %548 = vmatpush1.bf16.msra.mxu1 %v3011_v5  ;;  %v3013_v7 = vld [vmem:[%s3240_s16 + $0x7c] sm:$0xff]   ;;  %v3014_v8 = vld [vmem:[%s3240_s16 + $0x28] sm:$0xff]   ;;  %v3015_v9 = vld [vmem:[%s3240_s16 + $0x74] sm:$0xff]   ;;  %s3057_s13 = sshll.u32 %s3118_s25, 4  ;;  %s3058_s13 = int_to_ptr.vmem [resolvable:$false] %s3057_s13 }
  0x1a   : > { %845 = vperm.xlu0 %3009, %v837_v3   ;;  %428 = vmatprep.subr.bf16.mxu0 %v3115_v0  ;;  %v3016_v10 = vld [vmem:[%s3240_s16 + $0x20] sm:$0xff]   ;;  %v3017_v11 = vld [vmem:[%s3240_s16 + $0x6c] sm:$0xff]   ;;  %v3018_v12 = vld [vmem:[%s3240_s16 + $0x18] sm:$0xff]   ;;  %s3059_s27 = scalar_lea.vmem %s3058_s13, 32 }
  0x1b   : > { %549 = vmatprep.subr.bf16.mxu1 %v3115_v0  ;;  %v3019_v13 = vld [vmem:[%s3240_s16 + $0x64] sm:$0xff]   ;;  %v3020_v14 = vld [vmem:[%s3240_s16 + $0x10] sm:$0xff]   ;;  %v3021_v15 = vld [vmem:[%s3240_s16 + $0x5c] sm:$0xff]  }
  0x1c   : > { %v3022_v16 = vld [vmem:[%s3240_s16 + $0x8] sm:$0xff]   ;;  %v3023_v17 = vld [vmem:[%s3240_s16 + $0x54] sm:$0xff]   ;;  %v3024_v19 = vld [vmem:[%s3240_s16] sm:$0xff]  }
  0x1d   : > { %429 = vmatpush1.bf16.msra.mxu0 %v3012_v6  ;;  %550 = vmatpush1.bf16.msra.mxu1 %v3013_v7  ;;  %v3026_v18 = vld [vmem:[%s3240_s16 + $0x48] ss:$0 sps:$4 sm:$0x77]   ;;  %v3027_v20 = vld [vmem:[%s3240_s16 + $0x94] ss:$0 sps:$4 sm:$0x77]  }
  0x1e   : > { %430 = vmatprep.subr.bf16.mxu0 %v3115_v0  ;;  %551 = vmatprep.subr.bf16.mxu1 %v3115_v0  ;;  %v3025_v21 = vld [vmem:[%s3240_s16 + $0x4c] sm:$0xff]   ;;  %v424_v22 = vsel %vm422_vm1, %v3026_v18, 0  ;;  %v545_v23 = vsel %vm422_vm1, %v3027_v20, 0  ;;  %v3028_v24 = vld [vmem:[%s3240_s16 + $0x40] sm:$0xff]   ;;  %v3036_v30 = vld [vmem:[%s3240_s16 + $0x114] sm:$0xff]  }
  0x1f   : > { %v3029_v25 = vld [vmem:[%s3240_s16 + $0x8c] sm:$0xff]   ;;  %v3034_v28 = vld [vmem:[%s3240_s16 + $0x11c] sm:$0xff]   ;;  %v3040_v34 = vld [vmem:[%s3240_s16 + $0x104] sm:$0xff]  }
  0x20   : > { %v3033_v27 = vld [vmem:[%s3240_s16 + $0xd0] sm:$0xff]   ;;  %v3035_v29 = vld [vmem:[%s3240_s16 + $0xc8] sm:$0xff]   ;;  %v3037_v31 = vld [vmem:[%s3240_s16 + $0xc0] sm:$0xff]  }
  0x21   : > { %431 = vmatpush1.bf16.msra.mxu0 %v3014_v8  ;;  %552 = vmatpush1.bf16.msra.mxu1 %v3015_v9  ;;  %v3038_v32 = vld [vmem:[%s3240_s16 + $0x10c] sm:$0xff]   ;;  %v3039_v33 = vld [vmem:[%s3240_s16 + $0xb8] sm:$0xff]   ;;  %v3045_v39 = vld [vmem:[%s3240_s16 + $0xa0] sm:$0xff]  }
  0x22   : > { %432 = vmatprep.subr.bf16.mxu0 %v3115_v0  ;;  %553 = vmatprep.subr.bf16.mxu1 %v3115_v0  ;;  %v3041_v35 = vld [vmem:[%s3240_s16 + $0xb0] sm:$0xff]   ;;  %v3042_v36 = vld [vmem:[%s3240_s16 + $0xfc] sm:$0xff]   ;;  %v3043_v37 = vld [vmem:[%s3240_s16 + $0xa8] sm:$0xff]  }
  0x23   : > { %v3044_v38 = vld [vmem:[%s3240_s16 + $0xf4] sm:$0xff]   ;;  %v3046_v40 = vld [vmem:[%s3240_s16 + $0xec] sm:$0xff]   ;;  %v3048_v42 = vld [vmem:[%s3240_s16 + $0xe4] sm:$0xff]  }
  0x24   : > { %v3047_v41 = vld [vmem:[%s3240_s16 + $0x98] sm:$0xff]   ;;  %v3049_v43 = vld [vmem:[%s3240_s16 + $0xe0] ss:$0 sps:$4 sm:$0x77]   ;;  %v3052_v48 = vld [vmem:[%s3240_s16 + $0x124] sm:$0xff]  }
  0x25   : > { %433 = vmatpush1.bf16.msra.mxu0 %v3016_v10  ;;  %554 = vmatpush1.bf16.msra.mxu1 %v3017_v11  ;;  %v3050_v44 = vld [vmem:[%s3240_s16 + $0x12c] ss:$0 sps:$4 sm:$0x77]   ;;  %v666_v45 = vsel %vm422_vm1, %v3049_v43, 0  ;;  %v3051_v47 = vld [vmem:[%s3240_s16 + $0xd8] sm:$0xff]   ;;  %v2533_v20 = vld [vmem:[%s3861_s3 + $0xb0] sm:$0xff] }
  0x26   : > { %434 = vmatprep.subr.bf16.mxu0 %v3115_v0  ;;  %555 = vmatprep.subr.bf16.mxu1 %v3115_v0  ;;  %v787_v46 = vsel %vm422_vm1, %v3050_v44, 0  ;;  %v2534_v18 = vld [vmem:[%s3861_s3 + $0xb8] sm:$0x1]  ;;  %s2348_s16 = sshll.u32 %s324_s14, 4  ;;  %s2349_s16 = int_to_ptr.vmem [resolvable:$true] %s2348_s16 }
  0x27   : > { %v2574_v44 = vld [vmem:[%s3861_s3 + $0x1b8] sm:$0x1]  ;;  %s3053_s24 = scalar_lea.vmem %s2349_s16, 16  ;;  %p3060_p0 = scmp.lt.s32.totalorder %s2349_s16, %s3058_s13 }
  0x28   : > { %p3054_p11 = scmp.ne.s32.totalorder %s2349_s16, %s3053_s24  ;;  %p3061_p1 = scmp.lt.s32.totalorder %s3059_s27, %s3053_s24 }
  0x29   : > { %435 = vmatpush1.bf16.msra.mxu0 %v3018_v12  ;;  %556 = vmatpush1.bf16.msra.mxu1 %v3019_v13 }
  0x2a   : > { %436 = vmatprep.subr.bf16.mxu0 %v3115_v0  ;;  %557 = vmatprep.subr.bf16.mxu1 %v3115_v0  ;;  %p3055_p12 = pnand %p3054_p11, %p3207_p5  ;;  %p3062_p2 = por %p3061_p1, %p3060_p0 }
  0x2c   : > { %p3056_p13 = pneg %p3055_p12 }
  0x2d   : > { %437 = vmatpush1.bf16.msra.mxu0 %v3020_v14  ;;  %558 = vmatpush1.bf16.msra.mxu1 %v3021_v15 }
  0x2e   : > { %438 = vmatprep.subr.bf16.mxu0 %v3115_v0  ;;  %559 = vmatprep.subr.bf16.mxu1 %v3115_v0  ;;  %p3063_p3 = pnand %p3062_p2, %p3056_p13 }
  0x31   : > { %439 = vmatpush1.bf16.msra.mxu0 %v3022_v16  ;;  %560 = vmatpush1.bf16.msra.mxu1 %v3023_v17 }
  0x32   : > { %440 = vmatprep.subr.bf16.mxu0 %v3115_v0  ;;  %561 = vmatprep.subr.bf16.mxu1 %v3115_v0 }
  0x35   : > { %441 = vmatpush1.bf16.msra.mxu0 %v3024_v19  ;;  %562 = vmatpush1.bf16.msra.mxu1 %v3025_v21  ;;  %v2544_v19 = vld [vmem:[%s3861_s3 + $0xf8] sm:$0x1]  ;;  %v2543_v21 = vld [vmem:[%s3861_s3 + $0xf0] sm:$0xff] }
  0x36   : > { %454 = vmatprep.subr.bf16.mxu0 %v3115_v0  ;;  %575 = vmatprep.subr.bf16.mxu1 %v3115_v0 }
  0x39   : > { %455 = vmatpush2.bf16.msra.mxu0 %v424_v22  ;;  %576 = vmatpush2.bf16.msra.mxu1 %v545_v23  ;;  %v2532_v23 = vld [vmem:[%s3861_s3 + $0xa8] sm:$0xff] }
  0x3a   : > { %456 = vmatprep.subr.bf16.mxu0 %v3115_v0  ;;  %577 = vmatprep.subr.bf16.mxu1 %v3115_v0 }
  0x3d   : > { %457 = vmatpush2.bf16.msra.mxu0 %v3028_v24  ;;  %578 = vmatpush2.bf16.msra.mxu1 %v3029_v25  ;;  %v2542_v24 = vld [vmem:[%s3861_s3 + $0xe8] sm:$0xff] }
  0x3e   : > { %668 = vmatprep.subr.bf16.mxu0 %v3115_v0  ;;  %789 = vmatprep.subr.bf16.mxu1 %v3115_v0 }
  0x40   : > { %459 = vmatmul.mubr.bf16.vlgmr.msra.gmra.mxu0 %v3285_v26  ;;  %580 = vmatmul.mubr.bf16.vlgmr.msra.gmra.mxu1 %v3285_v26 }
  0x41   : > { %669 = vmatpush1.bf16.msra.mxu0 %v3033_v27  ;;  %790 = vmatpush1.bf16.msra.mxu1 %v3034_v28  ;;  %v2541_v28 = vld [vmem:[%s3861_s3 + $0xe0] sm:$0xff] }
  0x42   : > { %670 = vmatprep.subr.bf16.mxu0 %v3115_v0  ;;  %791 = vmatprep.subr.bf16.mxu1 %v3115_v0 }
  0x43   : > { %2480 = vmatprep.mubr.msk.bf16.mxu0 %vm418_vm0, %v3223_v1  ;;  %2510 = vmatprep.mubr.msk.bf16.mxu1 %vm418_vm0, %v3223_v1 }
  0x45   : > { %671 = vmatpush1.bf16.msra.mxu0 %v3035_v29  ;;  %792 = vmatpush1.bf16.msra.mxu1 %v3036_v30 }
  0x46   : > { %672 = vmatprep.subr.bf16.mxu0 %v3115_v0  ;;  %793 = vmatprep.subr.bf16.mxu1 %v3115_v0 }
  0x49   : > { %673 = vmatpush1.bf16.msra.mxu0 %v3037_v31  ;;  %794 = vmatpush1.bf16.msra.mxu1 %v3038_v32  ;;  %v2554_v32 = vld [vmem:[%s3861_s3 + $0x138] sm:$0x1] }
  0x4a   : > { %674 = vmatprep.subr.bf16.mxu0 %v3115_v0  ;;  %795 = vmatprep.subr.bf16.mxu1 %v3115_v0 }
  0x4d   : > { %675 = vmatpush1.bf16.msra.mxu0 %v3039_v33  ;;  %796 = vmatpush1.bf16.msra.mxu1 %v3040_v34  ;;  %v2564_v33 = vld [vmem:[%s3861_s3 + $0x178] sm:$0x1] }
  0x4e   : > { %676 = vmatprep.subr.bf16.mxu0 %v3115_v0  ;;  %797 = vmatprep.subr.bf16.mxu1 %v3115_v0 }
  0x51   : > { %677 = vmatpush1.bf16.msra.mxu0 %v3041_v35  ;;  %798 = vmatpush1.bf16.msra.mxu1 %v3042_v36  ;;  %v2553_v35 = vld [vmem:[%s3861_s3 + $0x130] sm:$0xff] }
  0x52   : > { %678 = vmatprep.subr.bf16.mxu0 %v3115_v0  ;;  %799 = vmatprep.subr.bf16.mxu1 %v3115_v0  ;;  %v2563_v36 = vld [vmem:[%s3861_s3 + $0x170] sm:$0xff] }
  0x55   : > { %679 = vmatpush1.bf16.msra.mxu0 %v3043_v37  ;;  %800 = vmatpush1.bf16.msra.mxu1 %v3044_v38  ;;  %v2552_v37 = vld [vmem:[%s3861_s3 + $0x128] sm:$0xff] }
  0x56   : > { %680 = vmatprep.subr.bf16.mxu0 %v3115_v0  ;;  %801 = vmatprep.subr.bf16.mxu1 %v3115_v0  ;;  %v2562_v38 = vld [vmem:[%s3861_s3 + $0x168] sm:$0xff] }
  0x59   : > { %681 = vmatpush1.bf16.msra.mxu0 %v3045_v39  ;;  %802 = vmatpush1.bf16.msra.mxu1 %v3046_v40  ;;  %v2551_v40 = vld [vmem:[%s3861_s3 + $0x120] sm:$0xff] }
  0x5a   : > { %682 = vmatprep.subr.bf16.mxu0 %v3115_v0  ;;  %803 = vmatprep.subr.bf16.mxu1 %v3115_v0 }
  0x5d   : > { %683 = vmatpush1.bf16.msra.mxu0 %v3047_v41  ;;  %804 = vmatpush1.bf16.msra.mxu1 %v3048_v42  ;;  %v2561_v41 = vld [vmem:[%s3861_s3 + $0x160] sm:$0xff] }
  0x5e   : > { %696 = vmatprep.subr.bf16.mxu0 %v3115_v0  ;;  %817 = vmatprep.subr.bf16.mxu1 %v3115_v0 }
  0x61   : > { %697 = vmatpush2.bf16.msra.mxu0 %v666_v45  ;;  %818 = vmatpush2.bf16.msra.mxu1 %v787_v46  ;;  %v2584_v45 = vld [vmem:[%s3861_s3 + $0x1f8] sm:$0x1]  ;;  %v2573_v46 = vld [vmem:[%s3861_s3 + $0x1b0] sm:$0xff] }
  0x62   : > { %698 = vmatprep.subr.bf16.mxu0 %v3115_v0  ;;  %819 = vmatprep.subr.bf16.mxu1 %v3115_v0 }
  0x65   : > { %699 = vmatpush2.bf16.msra.mxu0 %v3051_v47  ;;  %820 = vmatpush2.bf16.msra.mxu1 %v3052_v48  ;;  %v2583_v47 = vld [vmem:[%s3861_s3 + $0x1f0] sm:$0xff]  ;;  %v2572_v48 = vld [vmem:[%s3861_s3 + $0x1a8] sm:$0xff] }
  0x66   : > { %2720 = vmatprep.subr.mxu0 %v3116_v49  ;;  %2731 = vmatprep.subr.mxu1 %v3116_v49 }
  0x68   : > { %701 = vmatmul.mubr.bf16.vlgmr.msra.gmra.mxu0 %v3285_v26  ;;  %822 = vmatmul.mubr.bf16.vlgmr.msra.gmra.mxu1 %v3285_v26  ;;  %v2531_v26 = vld [vmem:[%s3861_s3 + $0xa0] sm:$0xff] }
  0x69   : > { %2721 = vmatpush3.msk.msra.mxu0 %vm866_vm2, %v2514_v50  ;;  %2732 = vmatpush3.msk.msra.mxu1 %vm866_vm2, %v2524_v51  ;;  %v2582_v50 = vld [vmem:[%s3861_s3 + $0x1e8] sm:$0xff]  ;;  %v2571_v51 = vld [vmem:[%s3861_s3 + $0x1a0] sm:$0xff] }
  0x6a   : > { %2722 = vmatprep.subr.mxu0 %v3116_v49  ;;  %2733 = vmatprep.subr.mxu1 %v3116_v49 }
  0x6b   : > { %2723 = vmatpush3.msra.mxu0 %v2513_v52  ;;  %2734 = vmatpush3.msra.mxu1 %v2523_v53  ;;  %v2581_v52 = vld [vmem:[%s3861_s3 + $0x1e0] sm:$0xff] }
  0x6c   : > { %2724 = vmatprep.subr.mxu0 %v3116_v49  ;;  %2735 = vmatprep.subr.mxu1 %v3116_v49 }
  0x6d   : > { %2725 = vmatpush3.msra.mxu0 %v2512_v54  ;;  %2736 = vmatpush3.msra.mxu1 %v2522_v55  ;;  %v855_v55 = vld [vmem:[%s3861_s3 + $0x18] sm:$0x1] }
  0x6e   : > { %2726 = vmatprep.subr.mxu0 %v3116_v49  ;;  %2737 = vmatprep.subr.mxu1 %v3116_v49 }
  0x6f   : > { %2727 = vmatpush3.msra.mxu0 %v2511_v56  ;;  %2738 = vmatpush3.msra.mxu1 %v2521_v57  ;;  %v2520_v56 = vld [vmem:[%s3861_s3 + $0x58] sm:$0x1]  ;;  %v854_v57 = vld [vmem:[%s3861_s3 + $0x10] sm:$0xff] }
  0x70   : > { %2728 = vmatprep.mubr.msk.f32.mxu0 %vm3117_vm3, %v3116_v49  ;;  %2739 = vmatprep.mubr.msk.f32.mxu1 %vm3117_vm3, %v3116_v49 }
  0x71   : > { %2742 = vmatprep.subr.mxu0 %v3116_v49  ;;  %2753 = vmatprep.subr.mxu1 %v3116_v49 }
  0x91   : > { %v841_v10 = vpop.permute.xlu0 %840 }
  0x95   : > { %v846_v31 = vpop.permute.xlu0 %845 }
 0x100   : > { %v460_v58 = vpop.f32.mrf.mxu0  ;;  %v581_v59 = vpop.f32.mrf.mxu1 }
 0x101   : > { %v830_v4 = vmax.f32 %v460_v58, %v581_v59  ;;  %v2519_v58 = vld [vmem:[%s3861_s3 + $0x50] sm:$0xff]  ;;  %v853_v59 = vld [vmem:[%s3861_s3 + $0x8] sm:$0xff] }
 0x102   : > { %v462_v60 = vpop.f32.mrf.mxu0  ;;  %v583_v61 = vpop.f32.mrf.mxu1 }
 0x103   : > { %v2518_v60 = vld [vmem:[%s3861_s3 + $0x48] sm:$0xff]  ;;  %v852_v61 = vld [vmem:[%s3861_s3] sm:$0xff] }
 0x104   : > { %v463_v62 = vpop.f32.mrf.mxu0  ;;  %v584_v63 = vpop.f32.mrf.mxu1 }
 0x105   : > { %v831_v25 = vmax.f32 %v463_v62, %v584_v63  ;;  %v2517_v62 = vld [vmem:[%s3861_s3 + $0x40] sm:$0xff] }
 0x106   : > { %v465_v0 = vpop.f32.mrf.mxu0  ;;  %v586_v1 = vpop.f32.mrf.mxu1 }
 0x107   : > { %v2530_v0 = vld [vmem:[%s3861_s3 + $0x98] sm:$0x1] }
 0x108   : > { %v2540_v1 = vld [vmem:[%s3861_s3 + $0xd8] sm:$0x1] }
 0x128   : > { %v702_v2 = vpop.f32.mrf.mxu0  ;;  %v823_v3 = vpop.f32.mrf.mxu1 }
 0x129   : > { %v832_v5 = vmax.f32 %v702_v2, %v823_v3  ;;  %v2529_v2 = vld [vmem:[%s3861_s3 + $0x90] sm:$0xff] }
 0x12a   : > { %v704_v6 = vpop.f32.mrf.mxu0  ;;  %v825_v7 = vpop.f32.mrf.mxu1  ;;  %v2539_v3 = vld [vmem:[%s3861_s3 + $0xd0] sm:$0xff] }
 0x12b   : > { %v834_v8 = vmax.f32 %v830_v4, %v832_v5  ;;  %v2528_v4 = vld [vmem:[%s3861_s3 + $0x88] sm:$0xff]  ;;  %v2527_v6 = vld [vmem:[%s3861_s3 + $0x80] sm:$0xff] }
 0x12c   : > { %v705_v9 = vpop.f32.mrf.mxu0  ;;  %v826_v11 = vpop.f32.mrf.mxu1  ;;  %v2538_v5 = vld [vmem:[%s3861_s3 + $0xc8] sm:$0xff]  ;;  %v2537_v7 = vld [vmem:[%s3861_s3 + $0xc0] sm:$0xff] }
 0x12d   : > { %v848_v12 = vadd.f32 %v841_v10, %v834_v8  ;;  %v833_v22 = vmax.f32 %v705_v9, %v826_v11  ;;  %v2550_v10 = vld [vmem:[%s3861_s3 + $0x118] sm:$0x1] }
 0x12e   : > { %v707_v13 = vpop.f32.mrf.mxu0  ;;  %v828_v14 = vpop.f32.mrf.mxu1  ;;  %v2560_v11 = vld [vmem:[%s3861_s3 + $0x158] sm:$0x1] }
 0x12f   : > { %v3377_v15 = vmax.f32 %v848_v12, 0.0  ;;  %v835_v27 = vmax.f32 %v831_v25, %v833_v22  ;;  %v2549_v12 = vld [vmem:[%s3861_s3 + $0x110] sm:$0xff]  ;;  %v2548_v14 = vld [vmem:[%s3861_s3 + $0x108] sm:$0xff]  ;;  %v2567_v25 = vld [vmem:[%s3861_s3 + $0x180] sm:$0xff] }
 0x130   : > { %v2559_v13 = vld [vmem:[%s3861_s3 + $0x150] sm:$0xff] }
 0x131   : > { %v862_v16 = vrot.slane %v3377_v15, 1  ;;  %v950_v17 = vrot.slane %v3377_v15, 3  ;;  %v1036_v29 = vrot.slane %v3377_v15, 5  ;;  %v1122_v30 = vrot.slane %v3377_v15, 7  ;;  %v2579_v22 = vld [vmem:[%s3861_s3 + $0x1d0] sm:$0xff] }
 0x132   : > { %v849_v34 = vadd.f32 %v846_v31, %v835_v27  ;;  %v1618_v63 = vrot.slane %v3377_v15, 2  ;;  %v1694_v8 = vrot.slane %v3377_v15, 4  ;;  %v1770_v9 = vrot.slane %v3377_v15, 6  ;;  %v2172_v31 = vld [vmem:[%s3863_s5 + $0x68] sm:$0xff] }
 0x133   : > { %2729 = vmatmul.mubr.msk.f32.vlgmr.msra.gmra.mxu0 %vm863_vm4, %v862_v16  ;;  %2740 = vmatmul.mubr.msk.f32.vlgmr.msra.gmra.mxu1 %vm863_vm4, %v950_v17  ;;  %v2547_v16 = vld [vmem:[%s3861_s3 + $0x100] sm:$0xff] }
 0x134   : > { %2743 = vmatpush3.msk.msra.mxu0 %vm866_vm2, %v2534_v18  ;;  %2754 = vmatpush3.msk.msra.mxu1 %vm866_vm2, %v2544_v19  ;;  %v3447_v39 = vmax.f32 %v849_v34, 0.0  ;;  %v2557_v17 = vld [vmem:[%s3861_s3 + $0x140] sm:$0xff]  ;;  %v2570_v19 = vld [vmem:[%s3861_s3 + $0x198] sm:$0x1]  ;;  %v2169_v34 = vld [vmem:[%s3863_s5 + $0x50] sm:$0xff] }
 0x135   : > { %2744 = vmatprep.subr.mxu0 %v3116_v49  ;;  %2755 = vmatprep.subr.mxu1 %v3116_v49 }
 0x136   : > { %2745 = vmatpush3.msra.mxu0 %v2533_v20  ;;  %2756 = vmatpush3.msra.mxu1 %v2543_v21  ;;  %v1209_v42 = vrot.slane %v3447_v39, 1  ;;  %v1295_v43 = vrot.slane %v3447_v39, 3  ;;  %v1381_v53 = vrot.slane %v3447_v39, 5  ;;  %v1467_v54 = vrot.slane %v3447_v39, 7  ;;  %v2580_v20 = vld [vmem:[%s3861_s3 + $0x1d8] sm:$0x1] }
 0x137   : > { %2746 = vmatprep.subr.mxu0 %v3116_v49  ;;  %2757 = vmatprep.subr.mxu1 %v3116_v49  ;;  %v1921_v18 = vrot.slane %v3447_v39, 2  ;;  %v2569_v21 = vld [vmem:[%s3861_s3 + $0x190] sm:$0xff]  ;;  %v1997_v27 = vrot.slane %v3447_v39, 4 }
 0x138   : > { %2747 = vmatpush3.msra.mxu0 %v2532_v23  ;;  %2758 = vmatpush3.msra.mxu1 %v2542_v24  ;;  %v2568_v23 = vld [vmem:[%s3861_s3 + $0x188] sm:$0xff] }
 0x139   : > { %2748 = vmatprep.subr.mxu0 %v3116_v49  ;;  %2759 = vmatprep.subr.mxu1 %v3116_v49  ;;  %v2578_v24 = vld [vmem:[%s3861_s3 + $0x1c8] sm:$0xff] }
 0x13a   : > { %2749 = vmatpush3.msra.mxu0 %v2531_v26  ;;  %2750 = vmatprep.mubr.msk.f32.mxu0 %vm3117_vm3, %v3116_v49  ;;  %v2577_v26 = vld [vmem:[%s3861_s3 + $0x1c0] sm:$0xff] }
 0x13b   : > { %2760 = vmatpush3.msra.mxu1 %v2541_v28  ;;  %2761 = vmatprep.mubr.msk.f32.mxu1 %vm3117_vm3, %v3116_v49  ;;  %v2073_v28 = vrot.slane %v3447_v39, 6 }
 0x13c   : > { %2751 = vmatmul.mubr.msk.f32.vlgmr.msra.gmra.mxu0 %vm863_vm4, %v1036_v29  ;;  %2762 = vmatmul.mubr.msk.f32.vlgmr.msra.gmra.mxu1 %vm863_vm4, %v1122_v30  ;;  %v2174_v29 = vld [vmem:[%s3863_s5 + $0x78] sm:$0xff]  ;;  %v2173_v30 = vld [vmem:[%s3863_s5 + $0x70] sm:$0xff] }
 0x13d   : > { %2764 = vmatprep.subr.mxu0 %v3116_v49  ;;  %2775 = vmatprep.subr.mxu1 %v3116_v49 }
 0x13e   : > { %2765 = vmatpush3.msk.msra.mxu0 %vm866_vm2, %v2554_v32  ;;  %2776 = vmatpush3.msk.msra.mxu1 %vm866_vm2, %v2564_v33  ;;  %v2171_v32 = vld [vmem:[%s3863_s5 + $0x60] sm:$0xff]  ;;  %v2170_v33 = vld [vmem:[%s3863_s5 + $0x58] sm:$0xff] }
 0x13f   : > { %2766 = vmatprep.subr.mxu0 %v3116_v49  ;;  %2777 = vmatprep.subr.mxu1 %v3116_v49 }
 0x140   : > { %2767 = vmatpush3.msra.mxu0 %v2553_v35  ;;  %2778 = vmatpush3.msra.mxu1 %v2563_v36  ;;  %v2168_v35 = vld [vmem:[%s3863_s5 + $0x48] sm:$0xff]  ;;  %v2167_v36 = vld [vmem:[%s3863_s5 + $0x40] sm:$0xff] }
 0x141   : > { %2768 = vmatprep.subr.mxu0 %v3116_v49  ;;  %2779 = vmatprep.subr.mxu1 %v3116_v49 }
 0x142   : > { %2769 = vmatpush3.msra.mxu0 %v2552_v37  ;;  %2780 = vmatpush3.msra.mxu1 %v2562_v38  ;;  %v2166_v37 = vld [vmem:[%s3863_s5 + $0x38] sm:$0xff]  ;;  %v2165_v38 = vld [vmem:[%s3863_s5 + $0x30] sm:$0xff] }
 0x143   : > { %2770 = vmatprep.subr.mxu0 %v3116_v49  ;;  %2781 = vmatprep.subr.mxu1 %v3116_v49 }
 0x144   : > { %2771 = vmatpush3.msra.mxu0 %v2551_v40  ;;  %2772 = vmatprep.mubr.msk.f32.mxu0 %vm3117_vm3, %v3116_v49  ;;  %v2163_v40 = vld [vmem:[%s3863_s5 + $0x20] sm:$0xff] }
 0x145   : > { %2782 = vmatpush3.msra.mxu1 %v2561_v41  ;;  %2783 = vmatprep.mubr.msk.f32.mxu1 %vm3117_vm3, %v3116_v49  ;;  %v2162_v41 = vld [vmem:[%s3863_s5 + $0x18] sm:$0xff] }
 0x146   : > { %2773 = vmatmul.mubr.msk.f32.vlgmr.msra.gmra.mxu0 %vm863_vm4, %v1209_v42  ;;  %2784 = vmatmul.mubr.msk.f32.vlgmr.msra.gmra.mxu1 %vm863_vm4, %v1295_v43  ;;  %v2161_v42 = vld [vmem:[%s3863_s5 + $0x10] sm:$0xff]  ;;  %v2160_v43 = vld [vmem:[%s3863_s5 + $0x8] sm:$0xff] }
 0x147   : > { %2786 = vmatprep.subr.mxu0 %v3116_v49  ;;  %2797 = vmatprep.subr.mxu1 %v3116_v49 }
 0x148   : > { %2787 = vmatpush3.msk.msra.mxu0 %vm866_vm2, %v2574_v44  ;;  %2798 = vmatpush3.msk.msra.mxu1 %vm866_vm2, %v2584_v45  ;;  %v2159_v44 = vld [vmem:[%s3863_s5] sm:$0xff]  ;;  %v2262_v45 = vld [vmem:[%s3865_s7 + $0x78] sm:$0xff] }
 0x149   : > { %2788 = vmatprep.subr.mxu0 %v3116_v49  ;;  %2799 = vmatprep.subr.mxu1 %v3116_v49 }
 0x14a   : > { %2789 = vmatpush3.msra.mxu0 %v2573_v46  ;;  %2800 = vmatpush3.msra.mxu1 %v2583_v47  ;;  %v2261_v46 = vld [vmem:[%s3865_s7 + $0x70] sm:$0xff]  ;;  %v2260_v47 = vld [vmem:[%s3865_s7 + $0x68] sm:$0xff] }
 0x14b   : > { %2790 = vmatprep.subr.mxu0 %v3116_v49  ;;  %2801 = vmatprep.subr.mxu1 %v3116_v49 }
 0x14c   : > { %2791 = vmatpush3.msra.mxu0 %v2572_v48  ;;  %2802 = vmatpush3.msra.mxu1 %v2582_v50  ;;  %v2259_v48 = vld [vmem:[%s3865_s7 + $0x60] sm:$0xff]  ;;  %v2258_v50 = vld [vmem:[%s3865_s7 + $0x58] sm:$0xff] }
 0x14d   : > { %2792 = vmatprep.subr.mxu0 %v3116_v49  ;;  %2803 = vmatprep.subr.mxu1 %v3116_v49 }
 0x14e   : > { %2793 = vmatpush3.msra.mxu0 %v2571_v51  ;;  %2794 = vmatprep.mubr.msk.f32.mxu0 %vm3117_vm3, %v3116_v49  ;;  %v2257_v51 = vld [vmem:[%s3865_s7 + $0x50] sm:$0xff] }
 0x14f   : > { %2804 = vmatpush3.msra.mxu1 %v2581_v52  ;;  %2805 = vmatprep.mubr.msk.f32.mxu1 %vm3117_vm3, %v3116_v49  ;;  %v2256_v52 = vld [vmem:[%s3865_s7 + $0x48] sm:$0xff] }
 0x150   : > { %2795 = vmatmul.mubr.msk.f32.vlgmr.msra.gmra.mxu0 %vm863_vm4, %v1381_v53  ;;  %2806 = vmatmul.mubr.msk.f32.vlgmr.msra.gmra.mxu1 %vm863_vm4, %v1467_v54  ;;  %v2255_v53 = vld [vmem:[%s3865_s7 + $0x40] sm:$0xff]  ;;  %v2254_v54 = vld [vmem:[%s3865_s7 + $0x38] sm:$0xff] }
 0x151   : > { %2808 = vmatprep.subr.mxu0 %v3116_v49  ;;  %2819 = vmatprep.subr.mxu1 %v3116_v49 }
 0x152   : > { %2809 = vmatpush3.msk.msra.mxu0 %vm866_vm2, %v855_v55  ;;  %2820 = vmatpush3.msk.msra.mxu1 %vm866_vm2, %v2520_v56  ;;  %v2253_v55 = vld [vmem:[%s3865_s7 + $0x30] sm:$0xff]  ;;  %v2252_v56 = vld [vmem:[%s3865_s7 + $0x28] sm:$0xff] }
 0x153   : > { %2810 = vmatprep.subr.mxu0 %v3116_v49  ;;  %2821 = vmatprep.subr.mxu1 %v3116_v49 }
 0x154   : > { %2811 = vmatpush3.msra.mxu0 %v854_v57  ;;  %2822 = vmatpush3.msra.mxu1 %v2519_v58  ;;  %v2251_v57 = vld [vmem:[%s3865_s7 + $0x20] sm:$0xff]  ;;  %v2250_v58 = vld [vmem:[%s3865_s7 + $0x18] sm:$0xff] }
 0x155   : > { %2812 = vmatprep.subr.mxu0 %v3116_v49  ;;  %2823 = vmatprep.subr.mxu1 %v3116_v49 }
 0x156   : > { %2813 = vmatpush3.msra.mxu0 %v853_v59  ;;  %2824 = vmatpush3.msra.mxu1 %v2518_v60 }
 0x157   : > { %2814 = vmatprep.subr.mxu0 %v3116_v49  ;;  %2825 = vmatprep.subr.mxu1 %v3116_v49 }
 0x158   : > { %2815 = vmatpush3.msra.mxu0 %v852_v61  ;;  %2816 = vmatprep.mubr.msk.f32.mxu0 %vm3117_vm3, %v3116_v49 }
 0x159   : > { %2826 = vmatpush3.msra.mxu1 %v2517_v62  ;;  %2827 = vmatprep.mubr.msk.f32.mxu1 %vm3117_vm3, %v3116_v49 }
 0x15a   : > { %2817 = vmatmul.mubr.msk.f32.vlgmr.msra.gmra.mxu0 %vm863_vm4, %v3377_v15  ;;  %2828 = vmatmul.mubr.msk.f32.vlgmr.msra.gmra.mxu1 %vm863_vm4, %v1618_v63  ;;  %v2558_v15 = vld [vmem:[%s3861_s3 + $0x148] sm:$0xff] }
 0x15b   : > { %2830 = vmatprep.subr.mxu0 %v3116_v49  ;;  %2841 = vmatprep.subr.mxu1 %v3116_v49 }
 0x15c   : > { %2831 = vmatpush3.msk.msra.mxu0 %vm866_vm2, %v2530_v0  ;;  %2842 = vmatpush3.msk.msra.mxu1 %vm866_vm2, %v2540_v1 }
 0x15d   : > { %2832 = vmatprep.subr.mxu0 %v3116_v49  ;;  %2843 = vmatprep.subr.mxu1 %v3116_v49 }
 0x15e   : > { %2833 = vmatpush3.msra.mxu0 %v2529_v2  ;;  %2844 = vmatpush3.msra.mxu1 %v2539_v3 }
 0x15f   : > { %2834 = vmatprep.subr.mxu0 %v3116_v49  ;;  %2845 = vmatprep.subr.mxu1 %v3116_v49 }
 0x160   : > { %2835 = vmatpush3.msra.mxu0 %v2528_v4  ;;  %2846 = vmatpush3.msra.mxu1 %v2538_v5 }
 0x161   : > { %2836 = vmatprep.subr.mxu0 %v3116_v49  ;;  %2847 = vmatprep.subr.mxu1 %v3116_v49 }
 0x162   : > { %2837 = vmatpush3.msra.mxu0 %v2527_v6  ;;  %2838 = vmatprep.mubr.msk.f32.mxu0 %vm3117_vm3, %v3116_v49 }
 0x163   : > { %2848 = vmatpush3.msra.mxu1 %v2537_v7  ;;  %2849 = vmatprep.mubr.msk.f32.mxu1 %vm3117_vm3, %v3116_v49 }
 0x164   : > { %2839 = vmatmul.mubr.msk.f32.vlgmr.msra.gmra.mxu0 %vm863_vm4, %v1694_v8  ;;  %2850 = vmatmul.mubr.msk.f32.vlgmr.msra.gmra.mxu1 %vm863_vm4, %v1770_v9 }
 0x165   : > { %2852 = vmatprep.subr.mxu0 %v3116_v49  ;;  %2863 = vmatprep.subr.mxu1 %v3116_v49 }
 0x166   : > { %2853 = vmatpush3.msk.msra.mxu0 %vm866_vm2, %v2550_v10  ;;  %2864 = vmatpush3.msk.msra.mxu1 %vm866_vm2, %v2560_v11 }
 0x167   : > { %2854 = vmatprep.subr.mxu0 %v3116_v49  ;;  %2865 = vmatprep.subr.mxu1 %v3116_v49 }
 0x168   : > { %2855 = vmatpush3.msra.mxu0 %v2549_v12  ;;  %2866 = vmatpush3.msra.mxu1 %v2559_v13 }
 0x169   : > { %2856 = vmatprep.subr.mxu0 %v3116_v49  ;;  %2867 = vmatprep.subr.mxu1 %v3116_v49 }
 0x16a   : > { %2857 = vmatpush3.msra.mxu0 %v2548_v14  ;;  %2868 = vmatpush3.msra.mxu1 %v2558_v15 }
 0x16b   : > { %2858 = vmatprep.subr.mxu0 %v3116_v49  ;;  %2869 = vmatprep.subr.mxu1 %v3116_v49 }
 0x16c   : > { %2859 = vmatpush3.msra.mxu0 %v2547_v16  ;;  %2860 = vmatprep.mubr.msk.f32.mxu0 %vm3117_vm3, %v3116_v49 }
 0x16d   : > { %2870 = vmatpush3.msra.mxu1 %v2557_v17  ;;  %2871 = vmatprep.mubr.msk.f32.mxu1 %vm3117_vm3, %v3116_v49 }
 0x16e   : > { %2861 = vmatmul.mubr.msk.f32.vlgmr.msra.gmra.mxu0 %vm863_vm4, %v3447_v39  ;;  %2872 = vmatmul.mubr.msk.f32.vlgmr.msra.gmra.mxu1 %vm863_vm4, %v1921_v18  ;;  %v2164_v39 = vld [vmem:[%s3863_s5 + $0x28] sm:$0xff] }
 0x16f   : > { %2874 = vmatprep.subr.mxu0 %v3116_v49  ;;  %2885 = vmatprep.subr.mxu1 %v3116_v49 }
 0x170   : > { %2875 = vmatpush3.msk.msra.mxu0 %vm866_vm2, %v2570_v19  ;;  %2886 = vmatpush3.msk.msra.mxu1 %vm866_vm2, %v2580_v20 }
 0x171   : > { %2876 = vmatprep.subr.mxu0 %v3116_v49  ;;  %2887 = vmatprep.subr.mxu1 %v3116_v49 }
 0x172   : > { %2877 = vmatpush3.msra.mxu0 %v2569_v21  ;;  %2888 = vmatpush3.msra.mxu1 %v2579_v22 }
 0x173   : > { %2878 = vmatprep.subr.mxu0 %v3116_v49  ;;  %2889 = vmatprep.subr.mxu1 %v3116_v49 }
 0x174   : > { %2879 = vmatpush3.msra.mxu0 %v2568_v23  ;;  %2890 = vmatpush3.msra.mxu1 %v2578_v24 }
 0x175   : > { %2880 = vmatprep.subr.mxu0 %v3116_v49  ;;  %2891 = vmatprep.subr.mxu1 %v3116_v49 }
 0x176   : > { %2881 = vmatpush3.msra.mxu0 %v2567_v25  ;;  %2882 = vmatprep.mubr.msk.f32.mxu0 %vm3117_vm3, %v3116_v49 }
 0x177   : > { %2892 = vmatpush3.msra.mxu1 %v2577_v26  ;;  %2893 = vmatprep.mubr.msk.f32.mxu1 %vm3117_vm3, %v3116_v49 }
 0x178   : > { %2883 = vmatmul.mubr.msk.f32.vlgmr.msra.gmra.mxu0 %vm863_vm4, %v1997_v27  ;;  %2894 = vmatmul.mubr.msk.f32.vlgmr.msra.gmra.mxu1 %vm863_vm4, %v2073_v28 }
 0x179   : > { %2896 = vmatprep.subr.mxu0 %v3116_v49  ;;  %2928 = vmatprep.mubr.msk.f32.mxu0 %vm3117_vm3, %v3116_v49 }
 0x17a   : > { %2931 = vmatprep.subr.mxu1 %v3116_v49  ;;  %2963 = vmatprep.mubr.msk.f32.mxu1 %vm3117_vm3, %v3116_v49 }
 0x17b   : > { %2897 = vmatpush3.msra.mxu0 %v2174_v29  ;;  %2932 = vmatpush3.msra.mxu1 %v2262_v45  ;;  %v2249_v45 = vld [vmem:[%s3865_s7 + $0x10] sm:$0xff] }
 0x17c   : > { %2898 = vmatprep.subr.mxu0 %v3116_v49  ;;  %2933 = vmatprep.subr.mxu1 %v3116_v49 }
 0x17d   : > { %2899 = vmatpush3.msra.mxu0 %v2173_v30  ;;  %2934 = vmatpush3.msra.mxu1 %v2261_v46  ;;  %v2248_v46 = vld [vmem:[%s3865_s7 + $0x8] sm:$0xff] }
 0x17e   : > { %2900 = vmatprep.subr.mxu0 %v3116_v49  ;;  %2935 = vmatprep.subr.mxu1 %v3116_v49 }
 0x17f   : > { %2901 = vmatpush3.msra.mxu0 %v2172_v31  ;;  %2936 = vmatpush3.msra.mxu1 %v2260_v47  ;;  %v2247_v47 = vld [vmem:[%s3865_s7] sm:$0xff] }
 0x180   : > { %2902 = vmatprep.subr.mxu0 %v3116_v49  ;;  %2937 = vmatprep.subr.mxu1 %v3116_v49 }
 0x181   : > { %2903 = vmatpush3.msra.mxu0 %v2171_v32  ;;  %2938 = vmatpush3.msra.mxu1 %v2259_v48  ;;  %v2175_v48 = vld [vmem:[%s3864_s6] sm:$0x1] }
 0x182   : > { %2904 = vmatprep.subr.mxu0 %v3116_v49  ;;  %2939 = vmatprep.subr.mxu1 %v3116_v49 }
 0x183   : > { %2905 = vmatpush3.msra.mxu0 %v2170_v33  ;;  %2940 = vmatpush3.msra.mxu1 %v2258_v50 }
 0x184   : > { %2906 = vmatprep.subr.mxu0 %v3116_v49  ;;  %2941 = vmatprep.subr.mxu1 %v3116_v49 }
 0x185   : > { %2907 = vmatpush3.msra.mxu0 %v2169_v34  ;;  %2942 = vmatpush3.msra.mxu1 %v2257_v51 }
 0x186   : > { %2908 = vmatprep.subr.mxu0 %v3116_v49  ;;  %2943 = vmatprep.subr.mxu1 %v3116_v49 }
 0x187   : > { %2909 = vmatpush3.msra.mxu0 %v2168_v35  ;;  %2944 = vmatpush3.msra.mxu1 %v2256_v52 }
 0x188   : > { %2910 = vmatprep.subr.mxu0 %v3116_v49  ;;  %2945 = vmatprep.subr.mxu1 %v3116_v49 }
 0x189   : > { %2911 = vmatpush3.msra.mxu0 %v2167_v36  ;;  %2946 = vmatpush3.msra.mxu1 %v2255_v53 }
 0x18a   : > { %2912 = vmatprep.subr.mxu0 %v3116_v49  ;;  %2947 = vmatprep.subr.mxu1 %v3116_v49 }
 0x18b   : > { %2913 = vmatpush3.msra.mxu0 %v2166_v37  ;;  %2948 = vmatpush3.msra.mxu1 %v2254_v54 }
 0x18c   : > { %2914 = vmatprep.subr.mxu0 %v3116_v49  ;;  %2949 = vmatprep.subr.mxu1 %v3116_v49 }
 0x18d   : > { %2915 = vmatpush3.msra.mxu0 %v2165_v38  ;;  %2950 = vmatpush3.msra.mxu1 %v2253_v55 }
 0x18e   : > { %2916 = vmatprep.subr.mxu0 %v3116_v49  ;;  %2951 = vmatprep.subr.mxu1 %v3116_v49 }
 0x18f   : > { %2917 = vmatpush3.msra.mxu0 %v2164_v39  ;;  %2952 = vmatpush3.msra.mxu1 %v2252_v56 }
 0x190   : > { %2918 = vmatprep.subr.mxu0 %v3116_v49  ;;  %2953 = vmatprep.subr.mxu1 %v3116_v49 }
 0x191   : > { %2919 = vmatpush3.msra.mxu0 %v2163_v40  ;;  %2954 = vmatpush3.msra.mxu1 %v2251_v57 }
 0x192   : > { %2920 = vmatprep.subr.mxu0 %v3116_v49  ;;  %2955 = vmatprep.subr.mxu1 %v3116_v49 }
 0x193   : > { %2921 = vmatpush3.msra.mxu0 %v2162_v41  ;;  %2956 = vmatpush3.msra.mxu1 %v2250_v58  ;;  %v2156_v41 = vld [vmem:[%s3862_s4] sm:$0x1] }
 0x194   : > { %2922 = vmatprep.subr.mxu0 %v3116_v49  ;;  %2957 = vmatprep.subr.mxu1 %v3116_v49 }
 0x195   : > { %2923 = vmatpush3.msra.mxu0 %v2161_v42  ;;  %2958 = vmatpush3.msra.mxu1 %v2249_v45 }
 0x196   : > { %2924 = vmatprep.subr.mxu0 %v3116_v49  ;;  %2959 = vmatprep.subr.mxu1 %v3116_v49 }
 0x197   : > { %2925 = vmatpush3.msra.mxu0 %v2160_v43  ;;  %2960 = vmatpush3.msra.mxu1 %v2248_v46 }
 0x198   : > { %2926 = vmatprep.subr.mxu0 %v3116_v49  ;;  %2961 = vmatprep.subr.mxu1 %v3116_v49  ;;  %v2263_v49 = vld [vmem:[%s3866_s8] sm:$0x1] }
 0x199   : > { %2927 = vmatpush3.msra.mxu0 %v2159_v44  ;;  %2962 = vmatpush3.msra.mxu1 %v2247_v47 }
 0x1f3   : > { %v936_v59 = vpop.f32.mrf.mxu0  ;;  %v1022_v60 = vpop.f32.mrf.mxu1 }
 0x1f5   : > { %v2730_v61 = vpop.f32.mrf.mxu0  ;;  %v2741_v62 = vpop.f32.mrf.mxu1 }
 0x1fc   : > { %v1108_v63 = vpop.f32.mrf.mxu0  ;;  %v1194_v0 = vpop.f32.mrf.mxu1 }
 0x1fe   : > { %v2752_v1 = vpop.f32.mrf.mxu0  ;;  %v2763_v2 = vpop.f32.mrf.mxu1 }
 0x206   : > { %v1281_v3 = vpop.f32.mrf.mxu0  ;;  %v1367_v4 = vpop.f32.mrf.mxu1 }
 0x208   : > { %v2774_v5 = vpop.f32.mrf.mxu0  ;;  %v2785_v6 = vpop.f32.mrf.mxu1 }
 0x210   : > { %v1453_v7 = vpop.f32.mrf.mxu0  ;;  %v1539_v8 = vpop.f32.mrf.mxu1 }
 0x212   : > { %v2796_v9 = vpop.f32.mrf.mxu0  ;;  %v2807_v10 = vpop.f32.mrf.mxu1 }
 0x21a   : > { %v1614_v11 = vpop.f32.mrf.mxu0  ;;  %v1690_v12 = vpop.f32.mrf.mxu1 }
 0x21b   : > { %v1615_v13 = vadd.f32 %v1614_v11, %v936_v59  ;;  %v1691_v14 = vadd.f32 %v1690_v12, %v1022_v60 }
 0x21c   : > { %v2818_v15 = vpop.f32.mrf.mxu0  ;;  %v2829_v16 = vpop.f32.mrf.mxu1 }
 0x21d   : > { %v2149_v17 = vadd.f32 %v1691_v14, %v1615_v13 }
 0x224   : > { %v1766_v18 = vpop.f32.mrf.mxu0  ;;  %v1842_v19 = vpop.f32.mrf.mxu1 }
 0x225   : > { %v1767_v26 = vadd.f32 %v1766_v18, %v1108_v63  ;;  %v1843_v27 = vadd.f32 %v1842_v19, %v1194_v0 }
 0x226   : > { %v2840_v20 = vpop.f32.mrf.mxu0  ;;  %v2851_v21 = vpop.f32.mrf.mxu1 }
 0x227   : > { %v2150_v32 = vadd.f32 %v1843_v27, %v1767_v26 }
 0x229   : > { %v2153_v39 = vadd.f32 %v2150_v32, %v2149_v17 }
 0x22e   : > { %v1917_v22 = vpop.f32.mrf.mxu0  ;;  %v1993_v23 = vpop.f32.mrf.mxu1 }
 0x22f   : > { %v1918_v28 = vadd.f32 %v1917_v22, %v1281_v3  ;;  %v1994_v29 = vadd.f32 %v1993_v23, %v1367_v4 }
 0x230   : > { %v2862_v24 = vpop.f32.mrf.mxu0  ;;  %v2873_v25 = vpop.f32.mrf.mxu1 }
 0x231   : > { %v2151_v37 = vadd.f32 %v1994_v29, %v1918_v28 }
 0x238   : > { %v2069_v30 = vpop.f32.mrf.mxu0  ;;  %v2145_v31 = vpop.f32.mrf.mxu1 }
 0x239   : > { %v2070_v33 = vadd.f32 %v2069_v30, %v1453_v7  ;;  %v2146_v34 = vadd.f32 %v2145_v31, %v1539_v8 }
 0x23a   : > { %v2884_v35 = vpop.f32.mrf.mxu0  ;;  %v2895_v36 = vpop.f32.mrf.mxu1 }
 0x23b   : > { %v2152_v38 = vadd.f32 %v2146_v34, %v2070_v33 }
 0x23d   : > { %v2154_v40 = vadd.f32 %v2152_v38, %v2151_v37 }
 0x23f   : > { %v2155_v42 = vadd.f32 %v2154_v40, %v2153_v39 }
 0x241   : > { %v2157_v43 = vadd.f32 %v2156_v41, %v2155_v42 }
 0x243   : > { %v2158_v44 = vmax.f32 %v2157_v43, 0.0 }
 0x245   : > { %2929 = vmatmul.mubr.f32.vlgmr.msra.gmra.mxu0 %v2158_v44 }
 0x305   : > { %v2242_v50 = vpop.f32.mrf.mxu0 }
 0x306   : > { %v2243_v51 = vadd.f32 %v2242_v50, %v2175_v48 }
 0x307   : > { %v2930_v52 = vpop.f32.mrf.mxu0 }
 0x308   : > { %v2246_v53 = vmax.f32 %v2243_v51, 0.0 }
 0x30a   : > { %2964 = vmatmul.mubr.f32.vlgmr.msra.gmra.mxu1 %v2246_v53 }
 0x3ca   : > { %v2330_v54 = vpop.f32.mrf.mxu1 }
 0x3cb   : > { %v2331_v55 = vadd.f32 %v2330_v54, %v2263_v49 }
 0x3cc   : > { %v2965_v56 = vpop.f32.mrf.mxu1 }
 0x3cd   : > { %2334 = vst [vmem:[%s324_s14] sm:$0x1] %v2331_v55 }
 0x3ce   : > { %3066 = shalt.err (!%p3063_p3)
}
 0x3cf   : > { %s3067_s28 = scalar_lea.hbm %s3823_s22, 16  ;;  %s3071_s14 = scalar_lea.hbm %s3867_s9, 32 }
 0x3d0   : > { %p3068_p4 = scmp.ne.s32.totalorder %s3823_s22, %s3067_s28  ;;  %p3072_p9 = scmp.lt.s32.totalorder %s3823_s22, %s3867_s9 }
 0x3d1   : > { %p3073_p10 = scmp.lt.s32.totalorder %s3071_s14, %s3067_s28 }
 0x3d2   : > { %p3069_p7 = pnand %p3068_p4, %p3207_p5 }
 0x3d3   : > { %p3074_p11 = por %p3073_p10, %p3072_p9 }
 0x3d4   : > { %p3070_p8 = pneg %p3069_p7 }
 0x3d6   : > { %p3075_p12 = pnand %p3074_p11, %p3070_p8 }
 0x3d8   : > { %3078 = shalt.err (!%p3075_p12)
}
 0x3d9   : > { %2967 = dma.vmem_to_hbm [thread:$0]  (%p3207_p5), %s2349_s16, 16, %s3823_s22, %s2336_s23  }
 0x3da PF: > { %p2973_p13 = scmp.ge.s32.totalorder %s3113_s12, 2  ;;  %s2360_s24 = sand.u32 1, %s3101_s30  }
 0x3db   : > { %s2361_s25 = scalar_lea.sflag [#allocation3], %s2360_s24 }
 0x3dc   : > { %p2970_p0 = pnand %p2973_p13, %p3211_p6 }
 0x3de   : > { %p2971_p1 = pneg %p2970_p0 }
 0x3e0   : > { %3096 = dma.done.wait (%p2971_p1), %s2361_s25, 16  }
 0x3e1   : > { %3098 = vsyncadd (%p2971_p1), %s2361_s25, 4294967280  ;;  %p19_p2 = scmp.ge.s32.totalorder %s3194_s15, 4   ;;  %s3870_s30 = smov %s3105_s10 }
 0x3e2   : > { %s3871_s10 = smov %s3109_s11  ;;  %s3872_s11 = smov %s3205_s18 }
 0x3e3   : > { %s3873_s12 = smov %s3194_s15  ;;  %21 = sbr.rel (!%p19_p2) target bundleno = 3 (0x3), region = 109 }
 0x3e8   :  { %2365 = vsyncpa [#allocation3], 1 }
 0x3e9   :  { %2367 = vsyncpa [#allocation3 + $0x1], 1 }

</bundles_post_ra>
